<compile_context>
chip_gen: v5e
topology: v5e:2x2
jax: 0.10.0
libtpu: 0.0.40
codegen_flags: <defaults>
</compile_context>

<pallas_src>
import functools

import jax
import jax.numpy as jnp
from jax.experimental import pallas as pl
from jax.experimental.pallas import tpu as pltpu


def _round_up(x, m):
    return x if x % m == 0 else ((x + m - 1) // m) * m


def _lstm_fc_kernel(x_ref,                      # (S*B, I)   time-major, batch padded
                    w0_ref,                     # (I, 8H)    wih0 interleaved, layer-1 cols = 0
                    bl0_ref,                    # (1, 8H)    b0 at layer-0 cols, 0 at layer-1 cols
                    bcat_ref,                   # (1, 8H)    b0 | b1 interleaved
                    wcat_ref,                   # (2H, 8H)   [[whh0, wih1], [0, whh1]] interleaved
                    wfc_ref,                    # (2H, O_pad) zero rows for h0, wfc rows for h1
                    bfc_ref,                    # (1, O_pad)
                    out_ref,                    # (B, O_pad)
                    *, seq_len, hidden_size, batch):
    S, H, B = seq_len, hidden_size, batch
    H2 = 2 * H

    # Hoisted layer-0 input projection (no recurrent dependency): one MXU call.
    # Column layout of the 8H gate axis: [i0 i1 | f0 f1 | g0 g1 | o0 o1].
    xw = jnp.dot(x_ref[...], w0_ref[...],
                 preferred_element_type=jnp.float32)          # (S*B, 8H)

    wcat = wcat_ref[...]
    bcat = bcat_ref[...]

    def apply_gates(gall, hc, cc):
        # gall: (B, 8H) pre-activations for BOTH cells (layer-0 @ t+1, layer-1 @ t).
        # hc = [h0 | h1], cc = [c0 | c1]  as (B, 2H) tiles.
        sig = jax.nn.sigmoid(gall)
        i_b = sig[:, 0 * H2:1 * H2]
        f_b = sig[:, 1 * H2:2 * H2]
        o_b = sig[:, 3 * H2:4 * H2]
        g_b = jnp.tanh(gall[:, 2 * H2:3 * H2])
        cc = f_b * cc + i_b * g_b
        hc = o_b * jnp.tanh(cc)
        return hc, cc

    # t = 0 "virtual" step: layer-0 gates = x_0 @ wih0 + b0 (h_{-1} = 0);
    # layer-1 columns of (xw + bl0) are exactly 0, so that half stays (h,c)=0.
    zeros2 = jnp.zeros((B, H2), jnp.float32)
    hc, cc = apply_gates(xw[0:B, :] + bl0_ref[...], zeros2, zeros2)

    # Fully-unrolled recurrence: exactly ONE recurrent matmul per step.
    # Loop invariant on entry: hc = [h0_t | h1_{t-1}], cc = [c0_t | c1_{t-1}].
    for t in range(S):
        pre = jnp.dot(hc, wcat, preferred_element_type=jnp.float32)   # (B, 8H)
        if t + 1 < S:
            gall = pre + xw[(t + 1) * B:(t + 2) * B, :] + bcat
        else:
            # Last step: only the layer-1 half is consumed afterwards; the
            # layer-0 half (fed just b0) is finite and discarded.
            gall = pre + bcat
        hc, cc = apply_gates(gall, hc, cc)

    # Fused final Linear on the last hidden state of layer 1: wfc_ref has zero
    # rows for the h0 half, so no lane extraction is needed.
    out = jnp.dot(hc, wfc_ref[...], preferred_element_type=jnp.float32) + bfc_ref[...]
    out_ref[...] = out.astype(out_ref.dtype)


def prepare_params(params):
    """One-time layout work: gate interleaving, block stacking, lane padding."""
    H = params["whh0"].shape[0]
    O = params["wfc"].shape[1]
    O_pad = _round_up(O, 128)

    def interleave(a, b):
        # a, b: (R, 4H) with gate order [i f g o]  ->  (R, 8H) as
        # [i_a i_b | f_a f_b | g_a g_b | o_a o_b].
        R = a.shape[0]
        a4 = a.reshape(R, 4, H)
        b4 = b.reshape(R, 4, H)
        return jnp.stack([a4, b4], axis=2).reshape(R, 8 * H)

    zI = jnp.zeros_like(params["wih0"])                    # (I, 4H)
    zH = jnp.zeros((H, 4 * H), jnp.float32)
    zb = jnp.zeros((1, 4 * H), jnp.float32)

    w0_big = interleave(params["wih0"], zI)                # (I, 8H)
    wcat = jnp.concatenate(
        [interleave(params["whh0"], params["wih1"]),       # h0 rows
         interleave(zH, params["whh1"])], axis=0)          # h1 rows -> (2H, 8H)
    b_l0 = interleave(params["b0"], zb)                    # (1, 8H)
    bcat = interleave(params["b0"], params["b1"])          # (1, 8H)

    wfc, bfc = params["wfc"], params["bfc"]
    if O_pad != O:
        wfc = jnp.pad(wfc, ((0, 0), (0, O_pad - O)))
        bfc = jnp.pad(bfc, ((0, 0), (0, O_pad - O)))
    wfc_big = jnp.concatenate([jnp.zeros((H, O_pad), jnp.float32), wfc], axis=0)

    return dict(w0_big=w0_big, b_l0=b_l0, bcat=bcat, wcat=wcat,
                wfc_big=wfc_big, bfc=bfc)


def weather_forecast_forward(x, kp, output_size=72 * 3):
    """x: (batch, seq, input_size) float32 -> (batch, 72, 3) float32."""
    B, S, I = x.shape
    H2, _ = kp["wcat"].shape
    H = H2 // 2
    O_pad = kp["wfc_big"].shape[1]

    B_pad = _round_up(max(B, 8), 8)        # fill the 8-sublane dimension

    # Per-call layout plumbing for the data only (weights prepared at init):
    # time-major, pad batch, flatten time.
    x_tm = jnp.transpose(x, (1, 0, 2))                       # (S, B, I)
    if B_pad != B:
        x_tm = jnp.pad(x_tm, ((0, 0), (0, B_pad - B), (0, 0)))
    x_2d = x_tm.reshape(S * B_pad, I)                        # (S*B_pad, I)

    kernel = functools.partial(_lstm_fc_kernel,
                               seq_len=S, hidden_size=H, batch=B_pad)

    vmem = pl.BlockSpec(memory_space=pltpu.MemorySpace.VMEM)
    out_flat = pl.pallas_call(
        kernel,
        out_shape=jax.ShapeDtypeStruct((B_pad, O_pad), jnp.float32),
        in_specs=[vmem] * 7,               # everything fully VMEM-resident
        out_specs=vmem,
    )(x_2d, kp["w0_big"], kp["b_l0"], kp["bcat"], kp["wcat"],
      kp["wfc_big"], kp["bfc"])

    return out_flat[:B, :output_size].reshape(-1, 72, 3)


def init_params(key, input_size, hidden_size, output_size):
    """Deterministic init matching the PyTorch module's parameter shapes."""
    H, I, O = hidden_size, input_size, output_size
    ks = jax.random.split(key, 10)
    bound = 1.0 / jnp.sqrt(H)

    def u(k, shape):
        return jax.random.uniform(k, shape, jnp.float32, -bound, bound)

    # PyTorch weights are (4H, in); pre-transpose so math is x @ W.
    wih0 = u(ks[0], (4 * H, I)).T
    whh0 = u(ks[1], (4 * H, H)).T
    b0 = (u(ks[2], (4 * H,)) + u(ks[3], (4 * H,))).reshape(1, 4 * H)   # b_ih + b_hh
    wih1 = u(ks[4], (4 * H, H)).T
    whh1 = u(ks[5], (4 * H, H)).T
    b1 = (u(ks[6], (4 * H,)) + u(ks[7], (4 * H,))).reshape(1, 4 * H)
    wfc = u(ks[8], (O, H)).T
    bfc = u(ks[9], (O,)).reshape(1, O)
    return dict(wih0=wih0, whh0=whh0, b0=b0,
                wih1=wih1, whh1=whh1, b1=b1,
                wfc=wfc, bfc=bfc)


def reference_forward(x, params):
    """Pure-JAX reference (same math as PyTorch nn.LSTM + Linear)."""
    B, S, I = x.shape
    H = params["whh0"].shape[0]
    hp = jax.lax.Precision.HIGHEST

    def cell(x_in, h, c, wih, whh, b):
        gates = (jnp.dot(x_in, wih, precision=hp)
                 + jnp.dot(h, whh, precision=hp) + b)
        i_g = jax.nn.sigmoid(gates[:, 0 * H:1 * H])
        f_g = jax.nn.sigmoid(gates[:, 1 * H:2 * H])
        g_g = jnp.tanh(gates[:, 2 * H:3 * H])
        o_g = jax.nn.sigmoid(gates[:, 3 * H:4 * H])
        c_new = f_g * c + i_g * g_g
        return o_g * jnp.tanh(c_new), c_new

    h0 = c0 = h1 = c1 = jnp.zeros((B, H), jnp.float32)
    for t in range(S):
        h0, c0 = cell(x[:, t, :], h0, c0, params["wih0"], params["whh0"], params["b0"])
        h1, c1 = cell(h0, h1, c1, params["wih1"], params["whh1"], params["b1"])
    out = jnp.dot(h1, params["wfc"], precision=hp) + params["bfc"]
    return out.reshape(-1, 72, 3)


if __name__ == "__main__":
    input_size = 8
    hidden_size = 32
    output_size = 72 * 3        # forward reshapes to (-1, 72, 3)
    batch = 4
    seq = 8

    key = jax.random.PRNGKey(0)
    k_x, k_p = jax.random.split(key)
    x = jax.random.normal(k_x, (batch, seq, input_size), jnp.float32)
    params = init_params(k_p, input_size, hidden_size, output_size)

    # One-time weight stacking / padding (hoisted out of the per-call path).
    kp = prepare_params(params)

    fwd = jax.jit(lambda xi: weather_forecast_forward(xi, kp))
    out = jax.block_until_ready(fwd(x))

    ref = reference_forward(x, params)
    assert out.shape == (batch, 72, 3), out.shape
    err = float(jnp.max(jnp.abs(out - ref)))
    assert jnp.allclose(out, ref, atol=5e-4, rtol=5e-4), f"mismatch vs reference: {err}"

    print("KERNEL_OK")
</pallas_src>

<mosaic_0001>
module attributes {stable_mosaic.version = 11 : i64} {
  func.func @_lstm_fc_kernel(%arg0: memref<64x8xf32, #tpu.memory_space<vmem>>, %arg1: memref<8x256xf32, #tpu.memory_space<vmem>>, %arg2: memref<1x256xf32, #tpu.memory_space<vmem>>, %arg3: memref<1x256xf32, #tpu.memory_space<vmem>>, %arg4: memref<64x256xf32, #tpu.memory_space<vmem>>, %arg5: memref<64x256xf32, #tpu.memory_space<vmem>>, %arg6: memref<1x256xf32, #tpu.memory_space<vmem>>, %arg7: memref<8x256xf32, #tpu.memory_space<vmem>>) attributes {dimension_semantics = [], scalar_prefetch = 0 : i64, scratch_operands = 0 : i64, tpu.core_type = #tpu.core_type<tc>} {
    %c0 = arith.constant 0 : index
    %c0_0 = arith.constant 0 : index
    %0 = vector.load %arg0[%c0, %c0_0] : memref<64x8xf32, #tpu.memory_space<vmem>>, vector<64x8xf32>
    %c0_1 = arith.constant 0 : index
    %c0_2 = arith.constant 0 : index
    %1 = vector.load %arg1[%c0_1, %c0_2] : memref<8x256xf32, #tpu.memory_space<vmem>>, vector<8x256xf32>
    %cst = arith.constant dense<0.000000e+00> : vector<64x256xf32>
    %2 = tpu.matmul %0, %1, %cst {dimension_numbers = #tpu.dot_dimension_numbers<[1], [0], [0], [1], [0, 0, 1, 1], [], []>} : vector<64x8xf32>, vector<8x256xf32>, vector<64x256xf32> -> vector<64x256xf32>
    %c0_3 = arith.constant 0 : index
    %c0_4 = arith.constant 0 : index
    %3 = vector.load %arg4[%c0_3, %c0_4] : memref<64x256xf32, #tpu.memory_space<vmem>>, vector<64x256xf32>
    %c0_5 = arith.constant 0 : index
    %c0_6 = arith.constant 0 : index
    %4 = vector.load %arg3[%c0_5, %c0_6] : memref<1x256xf32, #tpu.memory_space<vmem>>, vector<1x256xf32>
    %cst_7 = arith.constant 0.000000e+00 : f32
    %5 = vector.broadcast %cst_7 : f32 to vector<8x64xf32>
    %6 = vector.extract_strided_slice %2 {offsets = [0, 0], sizes = [8, 256], strides = [1, 1]} : vector<64x256xf32> to vector<8x256xf32>
    %c0_8 = arith.constant 0 : index
    %c0_9 = arith.constant 0 : index
    %7 = vector.load %arg2[%c0_8, %c0_9] : memref<1x256xf32, #tpu.memory_space<vmem>>, vector<1x256xf32>
    %8 = vector.broadcast %7 : vector<1x256xf32> to vector<8x256xf32>
    %9 = arith.addf %6, %8 : vector<8x256xf32>
    %10 = arith.negf %9 : vector<8x256xf32>
    %11 = math.exp %10 : vector<8x256xf32>
    %cst_10 = arith.constant 1.000000e+00 : f32
    %12 = vector.broadcast %cst_10 : f32 to vector<8x256xf32>
    %13 = arith.addf %12, %11 : vector<8x256xf32>
    %14 = arith.divf %12, %13 : vector<8x256xf32>
    %15 = vector.extract_strided_slice %14 {offsets = [0, 0], sizes = [8, 64], strides = [1, 1]} : vector<8x256xf32> to vector<8x64xf32>
    %16 = vector.extract_strided_slice %14 {offsets = [0, 64], sizes = [8, 64], strides = [1, 1]} : vector<8x256xf32> to vector<8x64xf32>
    %17 = vector.extract_strided_slice %14 {offsets = [0, 192], sizes = [8, 64], strides = [1, 1]} : vector<8x256xf32> to vector<8x64xf32>
    %18 = vector.extract_strided_slice %9 {offsets = [0, 128], sizes = [8, 64], strides = [1, 1]} : vector<8x256xf32> to vector<8x64xf32>
    %19 = math.tanh %18 : vector<8x64xf32>
    %20 = arith.mulf %16, %5 : vector<8x64xf32>
    %21 = arith.mulf %15, %19 : vector<8x64xf32>
    %22 = arith.addf %20, %21 : vector<8x64xf32>
    %23 = math.tanh %22 : vector<8x64xf32>
    %24 = arith.mulf %17, %23 : vector<8x64xf32>
    %cst_11 = arith.constant dense<0.000000e+00> : vector<8x256xf32>
    %25 = tpu.matmul %24, %3, %cst_11 {dimension_numbers = #tpu.dot_dimension_numbers<[1], [0], [0], [1], [0, 0, 1, 1], [], []>} : vector<8x64xf32>, vector<64x256xf32>, vector<8x256xf32> -> vector<8x256xf32>
    %26 = vector.extract_strided_slice %2 {offsets = [8, 0], sizes = [8, 256], strides = [1, 1]} : vector<64x256xf32> to vector<8x256xf32>
    %27 = arith.addf %25, %26 : vector<8x256xf32>
    %28 = vector.broadcast %4 : vector<1x256xf32> to vector<8x256xf32>
    %29 = arith.addf %27, %28 : vector<8x256xf32>
    %30 = arith.negf %29 : vector<8x256xf32>
    %31 = math.exp %30 : vector<8x256xf32>
    %cst_12 = arith.constant 1.000000e+00 : f32
    %32 = vector.broadcast %cst_12 : f32 to vector<8x256xf32>
    %33 = arith.addf %32, %31 : vector<8x256xf32>
    %34 = arith.divf %32, %33 : vector<8x256xf32>
    %35 = vector.extract_strided_slice %34 {offsets = [0, 0], sizes = [8, 64], strides = [1, 1]} : vector<8x256xf32> to vector<8x64xf32>
    %36 = vector.extract_strided_slice %34 {offsets = [0, 64], sizes = [8, 64], strides = [1, 1]} : vector<8x256xf32> to vector<8x64xf32>
    %37 = vector.extract_strided_slice %34 {offsets = [0, 192], sizes = [8, 64], strides = [1, 1]} : vector<8x256xf32> to vector<8x64xf32>
    %38 = vector.extract_strided_slice %29 {offsets = [0, 128], sizes = [8, 64], strides = [1, 1]} : vector<8x256xf32> to vector<8x64xf32>
    %39 = math.tanh %38 : vector<8x64xf32>
    %40 = arith.mulf %36, %22 : vector<8x64xf32>
    %41 = arith.mulf %35, %39 : vector<8x64xf32>
    %42 = arith.addf %40, %41 : vector<8x64xf32>
    %43 = math.tanh %42 : vector<8x64xf32>
    %44 = arith.mulf %37, %43 : vector<8x64xf32>
    %cst_13 = arith.constant dense<0.000000e+00> : vector<8x256xf32>
    %45 = tpu.matmul %44, %3, %cst_13 {dimension_numbers = #tpu.dot_dimension_numbers<[1], [0], [0], [1], [0, 0, 1, 1], [], []>} : vector<8x64xf32>, vector<64x256xf32>, vector<8x256xf32> -> vector<8x256xf32>
    %46 = vector.extract_strided_slice %2 {offsets = [16, 0], sizes = [8, 256], strides = [1, 1]} : vector<64x256xf32> to vector<8x256xf32>
    %47 = arith.addf %45, %46 : vector<8x256xf32>
    %48 = vector.broadcast %4 : vector<1x256xf32> to vector<8x256xf32>
    %49 = arith.addf %47, %48 : vector<8x256xf32>
    %50 = arith.negf %49 : vector<8x256xf32>
    %51 = math.exp %50 : vector<8x256xf32>
    %cst_14 = arith.constant 1.000000e+00 : f32
    %52 = vector.broadcast %cst_14 : f32 to vector<8x256xf32>
    %53 = arith.addf %52, %51 : vector<8x256xf32>
    %54 = arith.divf %52, %53 : vector<8x256xf32>
    %55 = vector.extract_strided_slice %54 {offsets = [0, 0], sizes = [8, 64], strides = [1, 1]} : vector<8x256xf32> to vector<8x64xf32>
    %56 = vector.extract_strided_slice %54 {offsets = [0, 64], sizes = [8, 64], strides = [1, 1]} : vector<8x256xf32> to vector<8x64xf32>
    %57 = vector.extract_strided_slice %54 {offsets = [0, 192], sizes = [8, 64], strides = [1, 1]} : vector<8x256xf32> to vector<8x64xf32>
    %58 = vector.extract_strided_slice %49 {offsets = [0, 128], sizes = [8, 64], strides = [1, 1]} : vector<8x256xf32> to vector<8x64xf32>
    %59 = math.tanh %58 : vector<8x64xf32>
    %60 = arith.mulf %56, %42 : vector<8x64xf32>
    %61 = arith.mulf %55, %59 : vector<8x64xf32>
    %62 = arith.addf %60, %61 : vector<8x64xf32>
    %63 = math.tanh %62 : vector<8x64xf32>
    %64 = arith.mulf %57, %63 : vector<8x64xf32>
    %cst_15 = arith.constant dense<0.000000e+00> : vector<8x256xf32>
    %65 = tpu.matmul %64, %3, %cst_15 {dimension_numbers = #tpu.dot_dimension_numbers<[1], [0], [0], [1], [0, 0, 1, 1], [], []>} : vector<8x64xf32>, vector<64x256xf32>, vector<8x256xf32> -> vector<8x256xf32>
    %66 = vector.extract_strided_slice %2 {offsets = [24, 0], sizes = [8, 256], strides = [1, 1]} : vector<64x256xf32> to vector<8x256xf32>
    %67 = arith.addf %65, %66 : vector<8x256xf32>
    %68 = vector.broadcast %4 : vector<1x256xf32> to vector<8x256xf32>
    %69 = arith.addf %67, %68 : vector<8x256xf32>
    %70 = arith.negf %69 : vector<8x256xf32>
    %71 = math.exp %70 : vector<8x256xf32>
    %cst_16 = arith.constant 1.000000e+00 : f32
    %72 = vector.broadcast %cst_16 : f32 to vector<8x256xf32>
    %73 = arith.addf %72, %71 : vector<8x256xf32>
    %74 = arith.divf %72, %73 : vector<8x256xf32>
    %75 = vector.extract_strided_slice %74 {offsets = [0, 0], sizes = [8, 64], strides = [1, 1]} : vector<8x256xf32> to vector<8x64xf32>
    %76 = vector.extract_strided_slice %74 {offsets = [0, 64], sizes = [8, 64], strides = [1, 1]} : vector<8x256xf32> to vector<8x64xf32>
    %77 = vector.extract_strided_slice %74 {offsets = [0, 192], sizes = [8, 64], strides = [1, 1]} : vector<8x256xf32> to vector<8x64xf32>
    %78 = vector.extract_strided_slice %69 {offsets = [0, 128], sizes = [8, 64], strides = [1, 1]} : vector<8x256xf32> to vector<8x64xf32>
    %79 = math.tanh %78 : vector<8x64xf32>
    %80 = arith.mulf %76, %62 : vector<8x64xf32>
    %81 = arith.mulf %75, %79 : vector<8x64xf32>
    %82 = arith.addf %80, %81 : vector<8x64xf32>
    %83 = math.tanh %82 : vector<8x64xf32>
    %84 = arith.mulf %77, %83 : vector<8x64xf32>
    %cst_17 = arith.constant dense<0.000000e+00> : vector<8x256xf32>
    %85 = tpu.matmul %84, %3, %cst_17 {dimension_numbers = #tpu.dot_dimension_numbers<[1], [0], [0], [1], [0, 0, 1, 1], [], []>} : vector<8x64xf32>, vector<64x256xf32>, vector<8x256xf32> -> vector<8x256xf32>
    %86 = vector.extract_strided_slice %2 {offsets = [32, 0], sizes = [8, 256], strides = [1, 1]} : vector<64x256xf32> to vector<8x256xf32>
    %87 = arith.addf %85, %86 : vector<8x256xf32>
    %88 = vector.broadcast %4 : vector<1x256xf32> to vector<8x256xf32>
    %89 = arith.addf %87, %88 : vector<8x256xf32>
    %90 = arith.negf %89 : vector<8x256xf32>
    %91 = math.exp %90 : vector<8x256xf32>
    %cst_18 = arith.constant 1.000000e+00 : f32
    %92 = vector.broadcast %cst_18 : f32 to vector<8x256xf32>
    %93 = arith.addf %92, %91 : vector<8x256xf32>
    %94 = arith.divf %92, %93 : vector<8x256xf32>
    %95 = vector.extract_strided_slice %94 {offsets = [0, 0], sizes = [8, 64], strides = [1, 1]} : vector<8x256xf32> to vector<8x64xf32>
    %96 = vector.extract_strided_slice %94 {offsets = [0, 64], sizes = [8, 64], strides = [1, 1]} : vector<8x256xf32> to vector<8x64xf32>
    %97 = vector.extract_strided_slice %94 {offsets = [0, 192], sizes = [8, 64], strides = [1, 1]} : vector<8x256xf32> to vector<8x64xf32>
    %98 = vector.extract_strided_slice %89 {offsets = [0, 128], sizes = [8, 64], strides = [1, 1]} : vector<8x256xf32> to vector<8x64xf32>
    %99 = math.tanh %98 : vector<8x64xf32>
    %100 = arith.mulf %96, %82 : vector<8x64xf32>
    %101 = arith.mulf %95, %99 : vector<8x64xf32>
    %102 = arith.addf %100, %101 : vector<8x64xf32>
    %103 = math.tanh %102 : vector<8x64xf32>
    %104 = arith.mulf %97, %103 : vector<8x64xf32>
    %cst_19 = arith.constant dense<0.000000e+00> : vector<8x256xf32>
    %105 = tpu.matmul %104, %3, %cst_19 {dimension_numbers = #tpu.dot_dimension_numbers<[1], [0], [0], [1], [0, 0, 1, 1], [], []>} : vector<8x64xf32>, vector<64x256xf32>, vector<8x256xf32> -> vector<8x256xf32>
    %106 = vector.extract_strided_slice %2 {offsets = [40, 0], sizes = [8, 256], strides = [1, 1]} : vector<64x256xf32> to vector<8x256xf32>
    %107 = arith.addf %105, %106 : vector<8x256xf32>
    %108 = vector.broadcast %4 : vector<1x256xf32> to vector<8x256xf32>
    %109 = arith.addf %107, %108 : vector<8x256xf32>
    %110 = arith.negf %109 : vector<8x256xf32>
    %111 = math.exp %110 : vector<8x256xf32>
    %cst_20 = arith.constant 1.000000e+00 : f32
    %112 = vector.broadcast %cst_20 : f32 to vector<8x256xf32>
    %113 = arith.addf %112, %111 : vector<8x256xf32>
    %114 = arith.divf %112, %113 : vector<8x256xf32>
    %115 = vector.extract_strided_slice %114 {offsets = [0, 0], sizes = [8, 64], strides = [1, 1]} : vector<8x256xf32> to vector<8x64xf32>
    %116 = vector.extract_strided_slice %114 {offsets = [0, 64], sizes = [8, 64], strides = [1, 1]} : vector<8x256xf32> to vector<8x64xf32>
    %117 = vector.extract_strided_slice %114 {offsets = [0, 192], sizes = [8, 64], strides = [1, 1]} : vector<8x256xf32> to vector<8x64xf32>
    %118 = vector.extract_strided_slice %109 {offsets = [0, 128], sizes = [8, 64], strides = [1, 1]} : vector<8x256xf32> to vector<8x64xf32>
    %119 = math.tanh %118 : vector<8x64xf32>
    %120 = arith.mulf %116, %102 : vector<8x64xf32>
    %121 = arith.mulf %115, %119 : vector<8x64xf32>
    %122 = arith.addf %120, %121 : vector<8x64xf32>
    %123 = math.tanh %122 : vector<8x64xf32>
    %124 = arith.mulf %117, %123 : vector<8x64xf32>
    %cst_21 = arith.constant dense<0.000000e+00> : vector<8x256xf32>
    %125 = tpu.matmul %124, %3, %cst_21 {dimension_numbers = #tpu.dot_dimension_numbers<[1], [0], [0], [1], [0, 0, 1, 1], [], []>} : vector<8x64xf32>, vector<64x256xf32>, vector<8x256xf32> -> vector<8x256xf32>
    %126 = vector.extract_strided_slice %2 {offsets = [48, 0], sizes = [8, 256], strides = [1, 1]} : vector<64x256xf32> to vector<8x256xf32>
    %127 = arith.addf %125, %126 : vector<8x256xf32>
    %128 = vector.broadcast %4 : vector<1x256xf32> to vector<8x256xf32>
    %129 = arith.addf %127, %128 : vector<8x256xf32>
    %130 = arith.negf %129 : vector<8x256xf32>
    %131 = math.exp %130 : vector<8x256xf32>
    %cst_22 = arith.constant 1.000000e+00 : f32
    %132 = vector.broadcast %cst_22 : f32 to vector<8x256xf32>
    %133 = arith.addf %132, %131 : vector<8x256xf32>
    %134 = arith.divf %132, %133 : vector<8x256xf32>
    %135 = vector.extract_strided_slice %134 {offsets = [0, 0], sizes = [8, 64], strides = [1, 1]} : vector<8x256xf32> to vector<8x64xf32>
    %136 = vector.extract_strided_slice %134 {offsets = [0, 64], sizes = [8, 64], strides = [1, 1]} : vector<8x256xf32> to vector<8x64xf32>
    %137 = vector.extract_strided_slice %134 {offsets = [0, 192], sizes = [8, 64], strides = [1, 1]} : vector<8x256xf32> to vector<8x64xf32>
    %138 = vector.extract_strided_slice %129 {offsets = [0, 128], sizes = [8, 64], strides = [1, 1]} : vector<8x256xf32> to vector<8x64xf32>
    %139 = math.tanh %138 : vector<8x64xf32>
    %140 = arith.mulf %136, %122 : vector<8x64xf32>
    %141 = arith.mulf %135, %139 : vector<8x64xf32>
    %142 = arith.addf %140, %141 : vector<8x64xf32>
    %143 = math.tanh %142 : vector<8x64xf32>
    %144 = arith.mulf %137, %143 : vector<8x64xf32>
    %cst_23 = arith.constant dense<0.000000e+00> : vector<8x256xf32>
    %145 = tpu.matmul %144, %3, %cst_23 {dimension_numbers = #tpu.dot_dimension_numbers<[1], [0], [0], [1], [0, 0, 1, 1], [], []>} : vector<8x64xf32>, vector<64x256xf32>, vector<8x256xf32> -> vector<8x256xf32>
    %146 = vector.extract_strided_slice %2 {offsets = [56, 0], sizes = [8, 256], strides = [1, 1]} : vector<64x256xf32> to vector<8x256xf32>
    %147 = arith.addf %145, %146 : vector<8x256xf32>
    %148 = vector.broadcast %4 : vector<1x256xf32> to vector<8x256xf32>
    %149 = arith.addf %147, %148 : vector<8x256xf32>
    %150 = arith.negf %149 : vector<8x256xf32>
    %151 = math.exp %150 : vector<8x256xf32>
    %cst_24 = arith.constant 1.000000e+00 : f32
    %152 = vector.broadcast %cst_24 : f32 to vector<8x256xf32>
    %153 = arith.addf %152, %151 : vector<8x256xf32>
    %154 = arith.divf %152, %153 : vector<8x256xf32>
    %155 = vector.extract_strided_slice %154 {offsets = [0, 0], sizes = [8, 64], strides = [1, 1]} : vector<8x256xf32> to vector<8x64xf32>
    %156 = vector.extract_strided_slice %154 {offsets = [0, 64], sizes = [8, 64], strides = [1, 1]} : vector<8x256xf32> to vector<8x64xf32>
    %157 = vector.extract_strided_slice %154 {offsets = [0, 192], sizes = [8, 64], strides = [1, 1]} : vector<8x256xf32> to vector<8x64xf32>
    %158 = vector.extract_strided_slice %149 {offsets = [0, 128], sizes = [8, 64], strides = [1, 1]} : vector<8x256xf32> to vector<8x64xf32>
    %159 = math.tanh %158 : vector<8x64xf32>
    %160 = arith.mulf %156, %142 : vector<8x64xf32>
    %161 = arith.mulf %155, %159 : vector<8x64xf32>
    %162 = arith.addf %160, %161 : vector<8x64xf32>
    %163 = math.tanh %162 : vector<8x64xf32>
    %164 = arith.mulf %157, %163 : vector<8x64xf32>
    %cst_25 = arith.constant dense<0.000000e+00> : vector<8x256xf32>
    %165 = tpu.matmul %164, %3, %cst_25 {dimension_numbers = #tpu.dot_dimension_numbers<[1], [0], [0], [1], [0, 0, 1, 1], [], []>} : vector<8x64xf32>, vector<64x256xf32>, vector<8x256xf32> -> vector<8x256xf32>
    %166 = vector.broadcast %4 : vector<1x256xf32> to vector<8x256xf32>
    %167 = arith.addf %165, %166 : vector<8x256xf32>
    %168 = arith.negf %167 : vector<8x256xf32>
    %169 = math.exp %168 : vector<8x256xf32>
    %cst_26 = arith.constant 1.000000e+00 : f32
    %170 = vector.broadcast %cst_26 : f32 to vector<8x256xf32>
    %171 = arith.addf %170, %169 : vector<8x256xf32>
    %172 = arith.divf %170, %171 : vector<8x256xf32>
    %173 = vector.extract_strided_slice %172 {offsets = [0, 0], sizes = [8, 64], strides = [1, 1]} : vector<8x256xf32> to vector<8x64xf32>
    %174 = vector.extract_strided_slice %172 {offsets = [0, 64], sizes = [8, 64], strides = [1, 1]} : vector<8x256xf32> to vector<8x64xf32>
    %175 = vector.extract_strided_slice %172 {offsets = [0, 192], sizes = [8, 64], strides = [1, 1]} : vector<8x256xf32> to vector<8x64xf32>
    %176 = vector.extract_strided_slice %167 {offsets = [0, 128], sizes = [8, 64], strides = [1, 1]} : vector<8x256xf32> to vector<8x64xf32>
    %177 = math.tanh %176 : vector<8x64xf32>
    %178 = arith.mulf %174, %162 : vector<8x64xf32>
    %179 = arith.mulf %173, %177 : vector<8x64xf32>
    %180 = arith.addf %178, %179 : vector<8x64xf32>
    %181 = math.tanh %180 : vector<8x64xf32>
    %182 = arith.mulf %175, %181 : vector<8x64xf32>
    %c0_27 = arith.constant 0 : index
    %c0_28 = arith.constant 0 : index
    %183 = vector.load %arg5[%c0_27, %c0_28] : memref<64x256xf32, #tpu.memory_space<vmem>>, vector<64x256xf32>
    %cst_29 = arith.constant dense<0.000000e+00> : vector<8x256xf32>
    %184 = tpu.matmul %182, %183, %cst_29 {dimension_numbers = #tpu.dot_dimension_numbers<[1], [0], [0], [1], [0, 0, 1, 1], [], []>} : vector<8x64xf32>, vector<64x256xf32>, vector<8x256xf32> -> vector<8x256xf32>
    %c0_30 = arith.constant 0 : index
    %c0_31 = arith.constant 0 : index
    %185 = vector.load %arg6[%c0_30, %c0_31] : memref<1x256xf32, #tpu.memory_space<vmem>>, vector<1x256xf32>
    %186 = vector.broadcast %185 : vector<1x256xf32> to vector<8x256xf32>
    %187 = arith.addf %184, %186 : vector<8x256xf32>
    %c0_32 = arith.constant 0 : index
    %c0_33 = arith.constant 0 : index
    %188 = vector.load %arg7[%c0_32, %c0_33] : memref<8x256xf32, #tpu.memory_space<vmem>>, vector<8x256xf32>
    tpu.vector_store %arg7[%c0_32, %c0_33], %187 {strides = array<i32>} : memref<8x256xf32, #tpu.memory_space<vmem>>, vector<8x256xf32>,
    return
  }
}

</mosaic_0001>

<bundles_post_ra>
// kernel: _lambda_.1
= control target key start
LH: loop header
LB: loop body
LE: loop exit
PB: predicated region body
PF: predicated region fallthrough
CT: control target
= control target key end

     0   :  { %12 = vsyncpa [#allocation3], 0  ;;  %s1260_s27 = smov [#allocation2]   ;;  %s1261_s29 = smov 256   ;;  %s1688_s0 = inlined_call_operand.vmem [shape: f32[64,8], index: 0, kind: input, shape index: {}]   ;;  %s1689_s1 = inlined_call_operand.vmem [shape: f32[8,256], index: 1, kind: input, shape index: {}]   ;;  %s1690_s2 = inlined_call_operand.vmem [shape: f32[1,256], index: 2, kind: input, shape index: {}]   ;;  %s1691_s3 = inlined_call_operand.vmem [shape: f32[1,256], index: 3, kind: input, shape index: {}]   ;;  %s1692_s4 = inlined_call_operand.hbm [shape: f32[64,256], index: 4, kind: input, shape index: {}]   ;;  %s1693_s5 = inlined_call_operand.vmem [shape: f32[64,256], index: 5, kind: input, shape index: {}]   ;;  %s1694_s6 = inlined_call_operand.vmem [shape: f32[1,256], index: 6, kind: input, shape index: {}]   ;;  %s1695_s7 = inlined_call_operand.vmem [shape: f32[8,256], index: 7, kind: output, shape index: {}]  }
   0x1   :  { %s25_s26 = sshll.u32 %s1692_s4, 4  ;;  %s27_s28 = sshll.u32 %s1260_s27, 4  ;;  %s26_s26 = int_to_ptr.hbm [resolvable:$true] %s25_s26  ;;  %s28_s28 = int_to_ptr.vmem [resolvable:$true] %s27_s28 }
   0x2   :  { %s1262_s30 = smov 16  }
   0x3   :  { %33 = dma.hbm_to_vmem [thread:$0]  %s26_s26, 2048, %s28_s28, [#allocation3], %s1261_s29, %s1261_s29, %s1262_s30  }
   0x4   :  { %1258 = dma.done.wait [#allocation3], 2048  }
   0x5   :  { %1259 = vsyncadd [#allocation3], 4294965248  ;;  %vm52_vm0 = vcmask 64512   ;;  %v50_v0 = vld [vmem:[%s1689_s1] sm:$0xff]  ;;  %v51_v2 = vld [vmem:[%s1689_s1 + $0x8] sm:$0xff]  ;;  %s1263_s1 = smov 64  }
   0x6   :  { %v42_v1 = vld [vmem:[%s1688_s0] sm:$0xff]  ;;  %92 = vmatpush.msra.mxu0 %v50_v0  ;;  %133 = vmatpush.msra.mxu1 %v51_v2  ;;  %v1327_v28 = vld [vmem:[#allocation2 + $0x70] sm:$0xff]  ;;  %v1329_v29 = vld [vmem:[#allocation2 + $0x78] sm:$0xff]  ;;  %vm235_vm9 = vcmask 523264  }
   0x7   :  { %1070 = vmatmul.msk.f32.vlgmr.msra.gmra.mxu0 %vm52_vm0, %v42_v1  ;;  %1078 = vmatmul.msk.f32.vlgmr.msra.gmra.mxu1 %vm52_vm0, %v42_v1  ;;  %v176_v3 = vld [vmem:[%s1690_s2] sm:$0x3]  ;;  %v1336_v31 = vld [vmem:[#allocation2 + $0x68] sm:$0xff]  ;;  %v1338_v32 = vld [vmem:[#allocation2 + $0x50] sm:$0xff] }
   0x8   :  { %v178_v4 = vperm.slane %v176_v3, 0  ;;  %v179_v10 = vperm.slane %v176_v3, 1  ;;  %v1331_v30 = vld [vmem:[#allocation2 + $0x60] sm:$0xff]  ;;  %246 = vmatpush.msra.mxu2 %v1327_v28  ;;  %266 = vmatpush.msra.mxu3 %v1329_v29  ;;  %v1340_v33 = vld [vmem:[#allocation2 + $0x58] sm:$0xff]  ;;  %v1348_v35 = vld [vmem:[#allocation2 + $0x48] sm:$0xff] }
   0x9   :  { %631 = vmatpush.msrb.mxu0 %v1327_v28  ;;  %651 = vmatpush.msrb.mxu1 %v1329_v29  ;;  %v1346_v34 = vld [vmem:[#allocation2 + $0x40] sm:$0xff]  ;;  %v1354_v36 = vld [vmem:[#allocation2 + $0x30] sm:$0xff]  ;;  %v1356_v37 = vld [vmem:[#allocation2 + $0x38] sm:$0xff] }
   0xa   :  { %247 = vmatpush.msra.mxu2 %v1331_v30  ;;  %267 = vmatpush.msra.mxu3 %v1336_v31  ;;  %v1364_v39 = vld [vmem:[#allocation2 + $0x20] sm:$0xff]  ;;  %v1366_v40 = vld [vmem:[#allocation2 + $0x28] sm:$0xff]  ;;  %v1374_v42 = vld [vmem:[#allocation2 + $0x10] sm:$0xff] }
   0xb   :  { %632 = vmatpush.msrb.mxu0 %v1331_v30  ;;  %652 = vmatpush.msrb.mxu1 %v1336_v31  ;;  %v1376_v43 = vld [vmem:[#allocation2 + $0x18] sm:$0xff]  ;;  %v1382_v44 = vld [vmem:[#allocation2] sm:$0xff]  ;;  %v1384_v45 = vld [vmem:[#allocation2 + $0x8] sm:$0xff] }
   0xc   :  { %248 = vmatpush.msra.mxu2 %v1338_v32  ;;  %268 = vmatpush.msra.mxu3 %v1340_v33  ;;  %v43_v60 = vld [vmem:[%s1688_s0 + $0x8] sm:$0xff]  ;;  %v175_v62 = vld [vmem:[%s1691_s3] sm:$0x3] }
   0xd   :  { %633 = vmatpush.msrb.mxu0 %v1338_v32  ;;  %653 = vmatpush.msrb.mxu1 %v1340_v33  ;;  %v1472_v0 = vperm.slane %v175_v62, 0 }
   0xe   :  { %249 = vmatpush.msra.mxu2 %v1346_v34  ;;  %269 = vmatpush.msra.mxu3 %v1348_v35 }
   0xf   :  { %634 = vmatpush.msrb.mxu0 %v1346_v34  ;;  %654 = vmatpush.msrb.mxu1 %v1348_v35 }
  0x10   :  { %250 = vmatpush.msra.mxu2 %v1354_v36  ;;  %270 = vmatpush.msra.mxu3 %v1356_v37 }
  0x11   :  { %635 = vmatpush.msrb.mxu0 %v1354_v36  ;;  %655 = vmatpush.msrb.mxu1 %v1356_v37 }
  0x12   :  { %251 = vmatpush.msra.mxu2 %v1364_v39  ;;  %271 = vmatpush.msra.mxu3 %v1366_v40 }
  0x13   :  { %636 = vmatpush.msrb.mxu0 %v1364_v39  ;;  %656 = vmatpush.msrb.mxu1 %v1366_v40 }
  0x14   :  { %252 = vmatpush.msra.mxu2 %v1374_v42  ;;  %272 = vmatpush.msra.mxu3 %v1376_v43 }
  0x15   :  { %637 = vmatpush.msrb.mxu0 %v1374_v42  ;;  %657 = vmatpush.msrb.mxu1 %v1376_v43 }
  0x16   :  { %253 = vmatpush.msra.mxu2 %v1382_v44  ;;  %273 = vmatpush.msra.mxu3 %v1384_v45 }
  0x17   :  { %638 = vmatpush.msrb.mxu0 %v1382_v44  ;;  %658 = vmatpush.msrb.mxu1 %v1384_v45 }
  0x18   :  { %346 = vmatpush.msrb.mxu2 %v1327_v28  ;;  %366 = vmatpush.msrb.mxu3 %v1329_v29 }
  0x19   :  { %821 = vmatpush.msra.mxu0 %v1327_v28  ;;  %841 = vmatpush.msra.mxu1 %v1329_v29 }
  0x1a   :  { %347 = vmatpush.msrb.mxu2 %v1331_v30  ;;  %367 = vmatpush.msrb.mxu3 %v1336_v31 }
  0x1b   :  { %822 = vmatpush.msra.mxu0 %v1331_v30  ;;  %842 = vmatpush.msra.mxu1 %v1336_v31 }
  0x1c   :  { %348 = vmatpush.msrb.mxu2 %v1338_v32  ;;  %368 = vmatpush.msrb.mxu3 %v1340_v33 }
  0x1d   :  { %823 = vmatpush.msra.mxu0 %v1338_v32  ;;  %843 = vmatpush.msra.mxu1 %v1340_v33 }
  0x1e   :  { %349 = vmatpush.msrb.mxu2 %v1346_v34  ;;  %369 = vmatpush.msrb.mxu3 %v1348_v35 }
  0x1f   :  { %824 = vmatpush.msra.mxu0 %v1346_v34  ;;  %844 = vmatpush.msra.mxu1 %v1348_v35 }
  0x20   :  { %350 = vmatpush.msrb.mxu2 %v1354_v36  ;;  %370 = vmatpush.msrb.mxu3 %v1356_v37 }
  0x21   :  { %825 = vmatpush.msra.mxu0 %v1354_v36  ;;  %845 = vmatpush.msra.mxu1 %v1356_v37 }
  0x22   :  { %351 = vmatpush.msrb.mxu2 %v1364_v39  ;;  %371 = vmatpush.msrb.mxu3 %v1366_v40 }
  0x23   :  { %826 = vmatpush.msra.mxu0 %v1364_v39  ;;  %846 = vmatpush.msra.mxu1 %v1366_v40 }
  0x24   :  { %352 = vmatpush.msrb.mxu2 %v1374_v42  ;;  %372 = vmatpush.msrb.mxu3 %v1376_v43 }
  0x25   :  { %827 = vmatpush.msra.mxu0 %v1374_v42  ;;  %847 = vmatpush.msra.mxu1 %v1376_v43 }
  0x26   :  { %353 = vmatpush.msrb.mxu2 %v1382_v44  ;;  %373 = vmatpush.msrb.mxu3 %v1384_v45 }
  0x27   :  { %828 = vmatpush.msra.mxu0 %v1382_v44  ;;  %848 = vmatpush.msra.mxu1 %v1384_v45 }
  0x28   :  { %1071 = vmatmul.msk.f32.gmra.mxu0 %vm52_vm0, %v43_v60  ;;  %1079 = vmatmul.msk.f32.gmra.mxu1 %vm52_vm0, %v43_v60 }
  0x84   :  { %v94_v5 = vpop.f32.mrf.mxu0  ;;  %v135_v11 = vpop.f32.mrf.mxu1 }
  0x85   :  { %v182_v6 = vadd.f32 %v178_v4, %v94_v5  ;;  %v183_v13 = vadd.f32 %v179_v10, %v135_v11  ;;  %v1475_v10 = vperm.slane %v175_v62, 1 }
  0x87   :  { %v1086_v7 = vmul.f32 -1.442695, %v182_v6  ;;  %v1087_v25 = vmul.f32 -1.442695, %v183_v13 }
  0x89   :  { %1126 = vpow2.f32 %v1086_v7 }
  0x8f   :  { %v1127_v8 = vpop.eup %1126 }
  0x90   :  { %v190_v9 = vadd.f32 1.0, %v1127_v8 }
  0x92   :  { %1128 = vrcp.f32 %v190_v9  ;;  %v203_v16 = vand.u32 2147483648, %v190_v9  ;;  %v201_v18 = vand.u32 2147483647, %v190_v9  ;;  %vm197_vm2 = vweird.f32 %v190_v9 }
  0x93   :  { %1130 = vtanh.f32 %v183_v13 }
  0x94   :  { %v204_v21 = vor.u32 1.1754944e-38, %v203_v16  ;;  %vm202_vm4 = vcmp.eq.f32.partialorder %v201_v18, 8.507059e+37  ;;  %1132 = vpow2.f32 %v1087_v25 }
  0x98   :  { %v1129_v12 = vpop.eup %1128 }
  0x99   :  { %v193_v14 = vmul.f32 %v1129_v12, %v190_v9  ;;  %vm198_vm1 = vweird.f32 %v1129_v12  ;;  %v1131_v20 = vpop.eup %1130 }
  0x9a   :  { %vm199_vm3 = vmor %vm197_vm2, %vm198_vm1  ;;  %v1133_v26 = vpop.eup %1132 }
  0x9b   :  { %v194_v15 = vsub.f32 1.0, %v193_v14  ;;  %v1325_v27 = vadd.f32 1.0, %v1133_v26 }
  0x9d   :  { %v195_v17 = vmul.f32 %v1129_v12, %v194_v15  ;;  %1134 = vrcp.f32 %v1325_v27  ;;  %vm212_vm5 = vweird.f32 %v1325_v27  ;;  %v218_v51 = vand.u32 2147483648, %v1325_v27 }
  0x9e   :  { %v216_v53 = vand.u32 2147483647, %v1325_v27 }
  0x9f   :  { %v196_v19 = vadd.f32 %v1129_v12, %v195_v17  ;;  %v219_v55 = vor.u32 1.1754944e-38, %v218_v51 }
  0xa0   :  { %vm217_vm8 = vcmp.eq.f32.partialorder %v216_v53, 8.507059e+37 }
  0xa1   :  { %v200_v22 = vsel %vm199_vm3, %v1129_v12, %v196_v19 }
  0xa2   :  { %v1321_v23 = vsel %vm202_vm4, %v204_v21, %v200_v22 }
  0xa3   :  { %v224_v24 = vmul.f32 %v1131_v20, %v1321_v23  ;;  %v1360_v38 = vpop.eup %1134  ;;  %v223_v48 = vmul.f32 0.0, %v1321_v23 }
  0xa4   :  { %v208_v41 = vmul.f32 %v1360_v38, %v1325_v27  ;;  %vm213_vm6 = vweird.f32 %v1360_v38 }
  0xa5   :  { %226 = vrot.lane.b32.xlu0 %v224_v24, %s1263_s1  ;;  %vm1418_vm7 = vmor %vm212_vm5, %vm213_vm6  ;;  %v97_v63 = vpop.f32.mrf.mxu0  ;;  %v138_v7 = vpop.f32.mrf.mxu1 }
  0xa6   :  { %v209_v46 = vsub.f32 1.0, %v208_v41 }
  0xa8   :  { %v210_v47 = vmul.f32 %v1360_v38, %v209_v46 }
  0xaa   :  { %v211_v52 = vadd.f32 %v1360_v38, %v210_v47 }
  0xac   :  { %v215_v56 = vsel %vm1418_vm7, %v1360_v38, %v211_v52 }
  0xad   :  { %v220_v58 = vsel %vm217_vm8, %v219_v55, %v215_v56 }
 0x117   :  { %v227_v49 = vpop.permute.xlu0 %226 }
 0x118   :  { %v1408_v50 = vadd.f32 %v227_v49, %v223_v48 }
 0x11a   :  { %1136 = vtanh.f32 %v1408_v50 }
 0x120   :  { %v1137_v57 = vpop.eup %1136 }
 0x121   :  { %v231_v59 = vmul.f32 %v1137_v57, %v220_v58 }
 0x123   :  { %233 = vrot.lane.b32.xlu0 %v231_v59, %s1263_s1 }
 0x195   :  { %v234_v61 = vpop.permute.xlu0 %233 }
 0x196   :  { %1088 = vmatmul.msk.f32.vlgmr.msra.gmra.mxu2 %vm235_vm9, %v234_v61  ;;  %1089 = vmatmul.msk.f32.vlgmr.msra.gmra.mxu3 %vm235_vm9, %v234_v61 }
 0x197   :  { %441 = vmatpush.msra.mxu2 %v1327_v28  ;;  %461 = vmatpush.msra.mxu3 %v1329_v29 }
 0x199   :  { %442 = vmatpush.msra.mxu2 %v1331_v30  ;;  %462 = vmatpush.msra.mxu3 %v1336_v31 }
 0x19b   :  { %443 = vmatpush.msra.mxu2 %v1338_v32  ;;  %463 = vmatpush.msra.mxu3 %v1340_v33 }
 0x19d   :  { %444 = vmatpush.msra.mxu2 %v1346_v34  ;;  %464 = vmatpush.msra.mxu3 %v1348_v35 }
 0x19f   :  { %445 = vmatpush.msra.mxu2 %v1354_v36  ;;  %465 = vmatpush.msra.mxu3 %v1356_v37 }
 0x1a1   :  { %446 = vmatpush.msra.mxu2 %v1364_v39  ;;  %466 = vmatpush.msra.mxu3 %v1366_v40 }
 0x1a3   :  { %447 = vmatpush.msra.mxu2 %v1374_v42  ;;  %467 = vmatpush.msra.mxu3 %v1376_v43 }
 0x1a5   :  { %448 = vmatpush.msra.mxu2 %v1382_v44  ;;  %468 = vmatpush.msra.mxu3 %v1384_v45 }
 0x219   :  { %v255_v1 = vpop.f32.mrf.mxu2  ;;  %v275_v8 = vpop.f32.mrf.mxu3 }
 0x21a   :  { %v256_v2 = vadd.f32 %v255_v1, %v97_v63  ;;  %v276_v9 = vadd.f32 %v275_v8, %v138_v7 }
 0x21c   :  { %v283_v3 = vadd.f32 %v1472_v0, %v256_v2  ;;  %v284_v12 = vadd.f32 %v1475_v10, %v276_v9 }
 0x21e   :  { %v1090_v4 = vmul.f32 -1.442695, %v283_v3  ;;  %v1091_v24 = vmul.f32 -1.442695, %v284_v12 }
 0x220   :  { %1138 = vpow2.f32 %v1090_v4 }
 0x226   :  { %v1139_v5 = vpop.eup %1138 }
 0x227   :  { %v291_v6 = vadd.f32 1.0, %v1139_v5 }
 0x229   :  { %1140 = vrcp.f32 %v291_v6  ;;  %v304_v15 = vand.u32 2147483648, %v291_v6  ;;  %v302_v17 = vand.u32 2147483647, %v291_v6  ;;  %vm298_vm11 = vweird.f32 %v291_v6 }
 0x22a   :  { %1142 = vtanh.f32 %v284_v12 }
 0x22b   :  { %v305_v19 = vor.u32 1.1754944e-38, %v304_v15  ;;  %vm303_vm13 = vcmp.eq.f32.partialorder %v302_v17, 8.507059e+37  ;;  %1144 = vpow2.f32 %v1091_v24 }
 0x22f   :  { %v1141_v11 = vpop.eup %1140 }
 0x230   :  { %v294_v13 = vmul.f32 %v1141_v11, %v291_v6  ;;  %vm299_vm10 = vweird.f32 %v1141_v11  ;;  %v1143_v21 = vpop.eup %1142 }
 0x231   :  { %vm300_vm12 = vmor %vm298_vm11, %vm299_vm10  ;;  %v1145_v25 = vpop.eup %1144 }
 0x232   :  { %v295_v14 = vsub.f32 1.0, %v294_v13  ;;  %v292_v26 = vadd.f32 1.0, %v1145_v25 }
 0x234   :  { %v296_v16 = vmul.f32 %v1141_v11, %v295_v14  ;;  %1146 = vrcp.f32 %v292_v26  ;;  %v319_v52 = vand.u32 2147483648, %v292_v26  ;;  %vm313_vm15 = vweird.f32 %v292_v26 }
 0x235   :  { %v317_v53 = vand.u32 2147483647, %v292_v26 }
 0x236   :  { %v297_v18 = vadd.f32 %v1141_v11, %v296_v16  ;;  %v320_v55 = vor.u32 1.1754944e-38, %v319_v52 }
 0x237   :  { %vm318_vm2 = vcmp.eq.f32.partialorder %v317_v53, 8.507059e+37 }
 0x238   :  { %v301_v20 = vsel %vm300_vm12, %v1141_v11, %v297_v18 }
 0x239   :  { %v306_v22 = vsel %vm303_vm13, %v305_v19, %v301_v20 }
 0x23a   :  { %v325_v23 = vmul.f32 %v1143_v21, %v306_v22  ;;  %v1147_v27 = vpop.eup %1146  ;;  %v324_v47 = vmul.f32 %v306_v22, %v1408_v50  ;;  %v44_v50 = vld [vmem:[%s1688_s0 + $0x10] sm:$0xff] }
 0x23b   :  { %v309_v38 = vmul.f32 %v1147_v27, %v292_v26  ;;  %vm314_vm14 = vweird.f32 %v1147_v27  ;;  %1072 = vmatmul.msk.f32.gmra.mxu0 %vm52_vm0, %v44_v50  ;;  %1080 = vmatmul.msk.f32.gmra.mxu1 %vm52_vm0, %v44_v50 }
 0x23c   :  { %327 = vrot.lane.b32.xlu1 %v325_v23, %s1263_s1  ;;  %vm315_vm1 = vmor %vm313_vm15, %vm314_vm14 }
 0x23d   :  { %v310_v41 = vsub.f32 1.0, %v309_v38 }
 0x23f   :  { %v311_v46 = vmul.f32 %v1147_v27, %v310_v41 }
 0x241   :  { %v312_v51 = vadd.f32 %v1147_v27, %v311_v46 }
 0x243   :  { %v316_v54 = vsel %vm315_vm1, %v1147_v27, %v312_v51 }
 0x244   :  { %v321_v57 = vsel %vm318_vm2, %v320_v55, %v316_v54 }
 0x2ae   :  { %v328_v48 = vpop.permute.xlu1 %327 }
 0x2af   :  { %v1480_v49 = vadd.f32 %v328_v48, %v324_v47 }
 0x2b1   :  { %1148 = vtanh.f32 %v1480_v49 }
 0x2b7   :  { %v1149_v56 = vpop.eup %1148 }
 0x2b8   :  { %v332_v58 = vmul.f32 %v1149_v56, %v321_v57  ;;  %v100_v60 = vpop.f32.mrf.mxu0  ;;  %v141_v4 = vpop.f32.mrf.mxu1 }
 0x2ba   :  { %334 = vrot.lane.b32.xlu1 %v332_v58, %s1263_s1 }
 0x32c   :  { %v335_v59 = vpop.permute.xlu1 %334 }
 0x32d   :  { %1092 = vmatmul.msk.f32.vlgmr.msrb.gmra.mxu2 %vm235_vm9, %v335_v59  ;;  %1093 = vmatmul.msk.f32.vlgmr.msrb.gmra.mxu3 %vm235_vm9, %v335_v59 }
 0x32e   :  { %536 = vmatpush.msrb.mxu2 %v1327_v28  ;;  %556 = vmatpush.msrb.mxu3 %v1329_v29 }
 0x330   :  { %537 = vmatpush.msrb.mxu2 %v1331_v30  ;;  %557 = vmatpush.msrb.mxu3 %v1336_v31 }
 0x332   :  { %538 = vmatpush.msrb.mxu2 %v1338_v32  ;;  %558 = vmatpush.msrb.mxu3 %v1340_v33 }
 0x334   :  { %539 = vmatpush.msrb.mxu2 %v1346_v34  ;;  %559 = vmatpush.msrb.mxu3 %v1348_v35 }
 0x336   :  { %540 = vmatpush.msrb.mxu2 %v1354_v36  ;;  %560 = vmatpush.msrb.mxu3 %v1356_v37 }
 0x338   :  { %541 = vmatpush.msrb.mxu2 %v1364_v39  ;;  %561 = vmatpush.msrb.mxu3 %v1366_v40 }
 0x33a   :  { %542 = vmatpush.msrb.mxu2 %v1374_v42  ;;  %562 = vmatpush.msrb.mxu3 %v1376_v43 }
 0x33c   :  { %543 = vmatpush.msrb.mxu2 %v1382_v44  ;;  %563 = vmatpush.msrb.mxu3 %v1384_v45 }
 0x3b0   :  { %v355_v61 = vpop.f32.mrf.mxu2  ;;  %v375_v5 = vpop.f32.mrf.mxu3 }
 0x3b1   :  { %v356_v62 = vadd.f32 %v355_v61, %v100_v60  ;;  %v376_v6 = vadd.f32 %v375_v5, %v141_v4 }
 0x3b3   :  { %v378_v63 = vadd.f32 %v356_v62, %v1472_v0  ;;  %v379_v8 = vadd.f32 %v376_v6, %v1475_v10 }
 0x3b5   :  { %v1094_v1 = vmul.f32 -1.442695, %v378_v63  ;;  %v1095_v21 = vmul.f32 -1.442695, %v379_v8 }
 0x3b7   :  { %1150 = vpow2.f32 %v1094_v1 }
 0x3bd   :  { %v1151_v2 = vpop.eup %1150 }
 0x3be   :  { %v386_v3 = vadd.f32 1.0, %v1151_v2 }
 0x3c0   :  { %1152 = vrcp.f32 %v386_v3  ;;  %v399_v12 = vand.u32 2147483648, %v386_v3  ;;  %v397_v14 = vand.u32 2147483647, %v386_v3  ;;  %vm393_vm4 = vweird.f32 %v386_v3 }
 0x3c1   :  { %1154 = vtanh.f32 %v379_v8 }
 0x3c2   :  { %v400_v16 = vor.u32 1.1754944e-38, %v399_v12  ;;  %vm398_vm6 = vcmp.eq.f32.partialorder %v397_v14, 8.507059e+37  ;;  %1156 = vpow2.f32 %v1095_v21 }
 0x3c6   :  { %v1153_v7 = vpop.eup %1152 }
 0x3c7   :  { %v389_v9 = vmul.f32 %v1153_v7, %v386_v3  ;;  %vm394_vm3 = vweird.f32 %v1153_v7  ;;  %v1155_v18 = vpop.eup %1154 }
 0x3c8   :  { %vm395_vm5 = vmor %vm393_vm4, %vm394_vm3  ;;  %v1157_v22 = vpop.eup %1156 }
 0x3c9   :  { %v390_v11 = vsub.f32 1.0, %v389_v9  ;;  %v387_v23 = vadd.f32 1.0, %v1157_v22 }
 0x3cb   :  { %v391_v13 = vmul.f32 %v1153_v7, %v390_v11  ;;  %1158 = vrcp.f32 %v387_v23  ;;  %v414_v48 = vand.u32 2147483648, %v387_v23  ;;  %vm408_vm8 = vweird.f32 %v387_v23 }
 0x3cc   :  { %v412_v51 = vand.u32 2147483647, %v387_v23 }
 0x3cd   :  { %v392_v15 = vadd.f32 %v1153_v7, %v391_v13  ;;  %v415_v53 = vor.u32 1.1754944e-38, %v414_v48 }
 0x3ce   :  { %vm413_vm11 = vcmp.eq.f32.partialorder %v412_v51, 8.507059e+37 }
 0x3cf   :  { %v396_v17 = vsel %vm395_vm5, %v1153_v7, %v392_v15 }
 0x3d0   :  { %v401_v19 = vsel %vm398_vm6, %v400_v16, %v396_v17 }
 0x3d1   :  { %v420_v20 = vmul.f32 %v1155_v18, %v401_v19  ;;  %v1159_v24 = vpop.eup %1158  ;;  %v419_v38 = vmul.f32 %v401_v19, %v1480_v49  ;;  %v45_v49 = vld [vmem:[%s1688_s0 + $0x18] sm:$0xff] }
 0x3d2   :  { %v404_v25 = vmul.f32 %v1159_v24, %v387_v23  ;;  %vm409_vm7 = vweird.f32 %v1159_v24  ;;  %1073 = vmatmul.msk.f32.gmra.mxu0 %vm52_vm0, %v45_v49  ;;  %1081 = vmatmul.msk.f32.gmra.mxu1 %vm52_vm0, %v45_v49 }
 0x3d3   :  { %422 = vrot.lane.b32.xlu2 %v420_v20, %s1263_s1  ;;  %vm410_vm10 = vmor %vm408_vm8, %vm409_vm7 }
 0x3d4   :  { %v405_v26 = vsub.f32 1.0, %v404_v25 }
 0x3d6   :  { %v406_v27 = vmul.f32 %v1159_v24, %v405_v26 }
 0x3d8   :  { %v407_v47 = vadd.f32 %v1159_v24, %v406_v27 }
 0x3da   :  { %v411_v52 = vsel %vm410_vm10, %v1159_v24, %v407_v47 }
 0x3db   :  { %v416_v55 = vsel %vm413_vm11, %v415_v53, %v411_v52 }
 0x42d   :  { %v423_v41 = vpop.permute.xlu2 %422 }
 0x42e   :  { %v1511_v46 = vadd.f32 %v423_v41, %v419_v38 }
 0x430   :  { %1160 = vtanh.f32 %v1511_v46 }
 0x436   :  { %v1161_v54 = vpop.eup %1160 }
 0x437   :  { %v427_v56 = vmul.f32 %v1161_v54, %v416_v55 }
 0x439   :  { %429 = vrot.lane.b32.xlu2 %v427_v56, %s1263_s1 }
 0x44f   :  { %v103_v58 = vpop.f32.mrf.mxu0  ;;  %v144_v1 = vpop.f32.mrf.mxu1 }
 0x493   :  { %v430_v57 = vpop.permute.xlu2 %429 }
 0x494   :  { %1096 = vmatmul.msk.f32.vlgmr.msra.gmra.mxu2 %vm235_vm9, %v430_v57  ;;  %1097 = vmatmul.msk.f32.vlgmr.msra.gmra.mxu3 %vm235_vm9, %v430_v57 }
 0x495   :  { %726 = vmatpush.msra.mxu2 %v1327_v28  ;;  %746 = vmatpush.msra.mxu3 %v1329_v29 }
 0x497   :  { %727 = vmatpush.msra.mxu2 %v1331_v30  ;;  %747 = vmatpush.msra.mxu3 %v1336_v31 }
 0x499   :  { %728 = vmatpush.msra.mxu2 %v1338_v32  ;;  %748 = vmatpush.msra.mxu3 %v1340_v33 }
 0x49b   :  { %729 = vmatpush.msra.mxu2 %v1346_v34  ;;  %749 = vmatpush.msra.mxu3 %v1348_v35 }
 0x49d   :  { %730 = vmatpush.msra.mxu2 %v1354_v36  ;;  %750 = vmatpush.msra.mxu3 %v1356_v37 }
 0x49f   :  { %731 = vmatpush.msra.mxu2 %v1364_v39  ;;  %751 = vmatpush.msra.mxu3 %v1366_v40 }
 0x4a1   :  { %732 = vmatpush.msra.mxu2 %v1374_v42  ;;  %752 = vmatpush.msra.mxu3 %v1376_v43 }
 0x4a3   :  { %733 = vmatpush.msra.mxu2 %v1382_v44  ;;  %753 = vmatpush.msra.mxu3 %v1384_v45 }
 0x517   :  { %v450_v50 = vpop.f32.mrf.mxu2  ;;  %v470_v2 = vpop.f32.mrf.mxu3 }
 0x518   :  { %v451_v59 = vadd.f32 %v450_v50, %v103_v58  ;;  %v471_v3 = vadd.f32 %v470_v2, %v144_v1  ;;  %v47_v1 = vld [vmem:[%s1688_s0 + $0x28] sm:$0xff]  ;;  %v48_v2 = vld [vmem:[%s1688_s0 + $0x30] sm:$0xff] }
 0x51a   :  { %v473_v60 = vadd.f32 %v451_v59, %v1472_v0  ;;  %v474_v5 = vadd.f32 %v471_v3, %v1475_v10 }
 0x51c   :  { %v1098_v61 = vmul.f32 -1.442695, %v473_v60  ;;  %v1099_v18 = vmul.f32 -1.442695, %v474_v5 }
 0x51e   :  { %1162 = vpow2.f32 %v1098_v61 }
 0x524   :  { %v1163_v62 = vpop.eup %1162 }
 0x525   :  { %v481_v63 = vadd.f32 1.0, %v1163_v62 }
 0x527   :  { %1164 = vrcp.f32 %v481_v63  ;;  %v494_v8 = vand.u32 2147483648, %v481_v63  ;;  %v492_v11 = vand.u32 2147483647, %v481_v63  ;;  %vm488_vm13 = vweird.f32 %v481_v63 }
 0x528   :  { %1166 = vtanh.f32 %v474_v5 }
 0x529   :  { %v495_v13 = vor.u32 1.1754944e-38, %v494_v8  ;;  %vm493_vm15 = vcmp.eq.f32.partialorder %v492_v11, 8.507059e+37  ;;  %1168 = vpow2.f32 %v1099_v18 }
 0x52d   :  { %v1165_v4 = vpop.eup %1164 }
 0x52e   :  { %v484_v6 = vmul.f32 %v1165_v4, %v481_v63  ;;  %vm489_vm12 = vweird.f32 %v1165_v4  ;;  %v1167_v15 = vpop.eup %1166 }
 0x52f   :  { %vm490_vm14 = vmor %vm488_vm13, %vm489_vm12  ;;  %v1169_v19 = vpop.eup %1168 }
 0x530   :  { %v485_v7 = vsub.f32 1.0, %v484_v6  ;;  %v482_v20 = vadd.f32 1.0, %v1169_v19  ;;  %v49_v6 = vld [vmem:[%s1688_s0 + $0x38] sm:$0xff] }
 0x532   :  { %v486_v9 = vmul.f32 %v1165_v4, %v485_v7  ;;  %1170 = vrcp.f32 %v482_v20  ;;  %v509_v41 = vand.u32 2147483648, %v482_v20  ;;  %vm503_vm2 = vweird.f32 %v482_v20 }
 0x533   :  { %v507_v47 = vand.u32 2147483647, %v482_v20 }
 0x534   :  { %v487_v12 = vadd.f32 %v1165_v4, %v486_v9  ;;  %v510_v51 = vor.u32 1.1754944e-38, %v509_v41 }
 0x535   :  { %vm508_vm4 = vcmp.eq.f32.partialorder %v507_v47, 8.507059e+37 }
 0x536   :  { %v491_v14 = vsel %vm490_vm14, %v1165_v4, %v487_v12 }
 0x537   :  { %v496_v16 = vsel %vm493_vm15, %v495_v13, %v491_v14 }
 0x538   :  { %v515_v17 = vmul.f32 %v1167_v15, %v496_v16  ;;  %v1171_v21 = vpop.eup %1170  ;;  %v514_v25 = vmul.f32 %v496_v16, %v1511_v46  ;;  %v46_v46 = vld [vmem:[%s1688_s0 + $0x20] sm:$0xff] }
 0x539   :  { %v499_v22 = vmul.f32 %v1171_v21, %v482_v20  ;;  %vm504_vm1 = vweird.f32 %v1171_v21  ;;  %1074 = vmatmul.msk.f32.gmra.mxu0 %vm52_vm0, %v46_v46  ;;  %1082 = vmatmul.msk.f32.gmra.mxu1 %vm52_vm0, %v46_v46 }
 0x53a   :  { %517 = vrot.lane.b32.xlu0 %v515_v17, %s1263_s1  ;;  %vm505_vm3 = vmor %vm503_vm2, %vm504_vm1 }
 0x53b   :  { %v500_v23 = vsub.f32 1.0, %v499_v22 }
 0x53d   :  { %v501_v24 = vmul.f32 %v1171_v21, %v500_v23 }
 0x53f   :  { %v502_v38 = vadd.f32 %v1171_v21, %v501_v24 }
 0x541   :  { %v506_v48 = vsel %vm505_vm3, %v1171_v21, %v502_v38  ;;  %1075 = vmatmul.msk.f32.gmra.mxu0 %vm52_vm0, %v47_v1  ;;  %1083 = vmatmul.msk.f32.gmra.mxu1 %vm52_vm0, %v47_v1 }
 0x542   :  { %v511_v53 = vsel %vm508_vm4, %v510_v51, %v506_v48 }
 0x549   :  { %1076 = vmatmul.msk.f32.gmra.mxu0 %vm52_vm0, %v48_v2  ;;  %1084 = vmatmul.msk.f32.gmra.mxu1 %vm52_vm0, %v48_v2 }
 0x551   :  { %1077 = vmatmul.msk.f32.gmra.mxu0 %vm52_vm0, %v49_v6  ;;  %1085 = vmatmul.msk.f32.gmra.mxu1 %vm52_vm0, %v49_v6 }
 0x5ac   :  { %v518_v26 = vpop.permute.xlu0 %517 }
 0x5ad   :  { %v1542_v27 = vadd.f32 %v518_v26, %v514_v25 }
 0x5af   :  { %1172 = vtanh.f32 %v1542_v27 }
 0x5b5   :  { %v1173_v52 = vpop.eup %1172 }
 0x5b6   :  { %v522_v54 = vmul.f32 %v1173_v52, %v511_v53 }
 0x5b8   :  { %524 = vrot.lane.b32.xlu1 %v522_v54, %s1263_s1 }
 0x62a   :  { %v525_v55 = vpop.permute.xlu1 %524 }
 0x62b   :  { %1100 = vmatmul.msk.f32.vlgmr.msrb.gmra.mxu2 %vm235_vm9, %v525_v55  ;;  %1101 = vmatmul.msk.f32.vlgmr.msrb.gmra.mxu3 %vm235_vm9, %v525_v55 }
 0x62c   :  { %916 = vmatpush.msrb.mxu2 %v1327_v28  ;;  %936 = vmatpush.msrb.mxu3 %v1329_v29  ;;  %v106_v28 = vpop.f32.mrf.mxu0 }
 0x62e   :  { %917 = vmatpush.msrb.mxu2 %v1331_v30  ;;  %937 = vmatpush.msrb.mxu3 %v1336_v31 }
 0x630   :  { %918 = vmatpush.msrb.mxu2 %v1338_v32  ;;  %938 = vmatpush.msrb.mxu3 %v1340_v33 }
 0x632   :  { %919 = vmatpush.msrb.mxu2 %v1346_v34  ;;  %939 = vmatpush.msrb.mxu3 %v1348_v35  ;;  %v147_v35 = vpop.f32.mrf.mxu1 }
 0x634   :  { %920 = vmatpush.msrb.mxu2 %v1354_v36  ;;  %940 = vmatpush.msrb.mxu3 %v1356_v37  ;;  %v109_v21 = vpop.f32.mrf.mxu0 }
 0x636   :  { %921 = vmatpush.msrb.mxu2 %v1364_v39  ;;  %941 = vmatpush.msrb.mxu3 %v1366_v40 }
 0x638   :  { %922 = vmatpush.msrb.mxu2 %v1374_v42  ;;  %942 = vmatpush.msrb.mxu3 %v1376_v43 }
 0x63a   :  { %923 = vmatpush.msrb.mxu2 %v1382_v44  ;;  %943 = vmatpush.msrb.mxu3 %v1384_v45  ;;  %v150_v23 = vpop.f32.mrf.mxu1 }
 0x63c   :  { %v1591_v22 = vpop.f32.mrf.mxu0 }
 0x642   :  { %v1595_v25 = vpop.f32.mrf.mxu1 }
 0x644   :  { %v1593_v24 = vpop.f32.mrf.mxu0 }
 0x64a   :  { %v1598_v41 = vpop.f32.mrf.mxu1 }
 0x6ae   :  { %v545_v29 = vpop.f32.mrf.mxu2  ;;  %v565_v36 = vpop.f32.mrf.mxu3 }
 0x6af   :  { %v546_v30 = vadd.f32 %v545_v29, %v106_v28  ;;  %v566_v37 = vadd.f32 %v565_v36, %v147_v35 }
 0x6b1   :  { %v568_v31 = vadd.f32 %v546_v30, %v1472_v0  ;;  %v569_v40 = vadd.f32 %v566_v37, %v1475_v10 }
 0x6b3   :  { %v1102_v32 = vmul.f32 -1.442695, %v568_v31  ;;  %v1103_v61 = vmul.f32 -1.442695, %v569_v40 }
 0x6b5   :  { %1174 = vpow2.f32 %v1102_v32 }
 0x6bb   :  { %v1175_v33 = vpop.eup %1174 }
 0x6bc   :  { %v576_v34 = vadd.f32 1.0, %v1175_v33 }
 0x6be   :  { %1176 = vrcp.f32 %v576_v34  ;;  %v589_v44 = vand.u32 2147483648, %v576_v34  ;;  %v587_v56 = vand.u32 2147483647, %v576_v34  ;;  %vm583_vm6 = vweird.f32 %v576_v34 }
 0x6bf   :  { %1178 = vtanh.f32 %v569_v40 }
 0x6c0   :  { %v590_v57 = vor.u32 1.1754944e-38, %v589_v44  ;;  %vm588_vm8 = vcmp.eq.f32.partialorder %v587_v56, 8.507059e+37  ;;  %1180 = vpow2.f32 %v1103_v61 }
 0x6c4   :  { %v1177_v39 = vpop.eup %1176 }
 0x6c5   :  { %v579_v42 = vmul.f32 %v1177_v39, %v576_v34  ;;  %vm584_vm5 = vweird.f32 %v1177_v39  ;;  %v1179_v50 = vpop.eup %1178 }
 0x6c6   :  { %vm585_vm7 = vmor %vm583_vm6, %vm584_vm5  ;;  %v1181_v62 = vpop.eup %1180 }
 0x6c7   :  { %v580_v43 = vsub.f32 1.0, %v579_v42  ;;  %v577_v63 = vadd.f32 1.0, %v1181_v62 }
 0x6c9   :  { %v581_v45 = vmul.f32 %v1177_v39, %v580_v43  ;;  %1182 = vrcp.f32 %v577_v63  ;;  %v604_v13 = vand.u32 2147483648, %v577_v63  ;;  %vm598_vm11 = vweird.f32 %v577_v63 }
 0x6ca   :  { %v602_v14 = vand.u32 2147483647, %v577_v63 }
 0x6cb   :  { %v582_v49 = vadd.f32 %v1177_v39, %v581_v45  ;;  %v605_v16 = vor.u32 1.1754944e-38, %v604_v13 }
 0x6cc   :  { %vm603_vm13 = vcmp.eq.f32.partialorder %v602_v14, 8.507059e+37 }
 0x6cd   :  { %v586_v58 = vsel %vm585_vm7, %v1177_v39, %v582_v49 }
 0x6ce   :  { %v591_v59 = vsel %vm588_vm8, %v590_v57, %v586_v58 }
 0x6cf   :  { %v610_v60 = vmul.f32 %v1179_v50, %v591_v59  ;;  %v1183_v3 = vpop.eup %1182  ;;  %v609_v8 = vmul.f32 %v591_v59, %v1542_v27 }
 0x6d0   :  { %v594_v4 = vmul.f32 %v1183_v3, %v577_v63  ;;  %vm599_vm10 = vweird.f32 %v1183_v3 }
 0x6d1   :  { %612 = vrot.lane.b32.xlu2 %v610_v60, %s1263_s1  ;;  %vm600_vm12 = vmor %vm598_vm11, %vm599_vm10 }
 0x6d2   :  { %v595_v5 = vsub.f32 1.0, %v594_v4 }
 0x6d4   :  { %v596_v7 = vmul.f32 %v1183_v3, %v595_v5 }
 0x6d6   :  { %v597_v12 = vadd.f32 %v1183_v3, %v596_v7 }
 0x6d8   :  { %v601_v15 = vsel %vm600_vm12, %v1183_v3, %v597_v12 }
 0x6d9   :  { %v606_v18 = vsel %vm603_vm13, %v605_v16, %v601_v15 }
 0x72b   :  { %v613_v9 = vpop.permute.xlu2 %612 }
 0x72c   :  { %v615_v11 = vadd.f32 %v613_v9, %v609_v8 }
 0x72e   :  { %1184 = vtanh.f32 %v615_v11 }
 0x734   :  { %v1185_v17 = vpop.eup %1184 }
 0x735   :  { %v617_v19 = vmul.f32 %v1185_v17, %v606_v18 }
 0x737   :  { %619 = vrot.lane.b32.xlu0 %v617_v19, %s1263_s1 }
 0x7a9   :  { %v620_v20 = vpop.permute.xlu0 %619 }
 0x7aa   :  { %1104 = vmatmul.msk.f32.vlgmr.msrb.gmra.mxu0 %vm235_vm9, %v620_v20  ;;  %1105 = vmatmul.msk.f32.vlgmr.msrb.gmra.mxu1 %vm235_vm9, %v620_v20 }
 0x827   :  { %v640_v26 = vpop.f32.mrf.mxu0  ;;  %v660_v52 = vpop.f32.mrf.mxu1 }
 0x828   :  { %v641_v27 = vadd.f32 %v640_v26, %v109_v21  ;;  %v661_v53 = vadd.f32 %v660_v52, %v150_v23 }
 0x82a   :  { %v663_v38 = vadd.f32 %v641_v27, %v1472_v0  ;;  %v664_v46 = vadd.f32 %v661_v53, %v1475_v10 }
 0x82c   :  { %v1106_v47 = vmul.f32 -1.442695, %v663_v38  ;;  %v1107_v39 = vmul.f32 -1.442695, %v664_v46 }
 0x82e   :  { %1186 = vpow2.f32 %v1106_v47 }
 0x834   :  { %v1187_v48 = vpop.eup %1186 }
 0x835   :  { %v671_v51 = vadd.f32 1.0, %v1187_v48 }
 0x837   :  { %1188 = vrcp.f32 %v671_v51  ;;  %v684_v29 = vand.u32 2147483648, %v671_v51  ;;  %v682_v31 = vand.u32 2147483647, %v671_v51  ;;  %vm678_vm14 = vweird.f32 %v671_v51 }
 0x838   :  { %1190 = vtanh.f32 %v664_v46 }
 0x839   :  { %v685_v33 = vor.u32 1.1754944e-38, %v684_v29  ;;  %vm683_vm1 = vcmp.eq.f32.partialorder %v682_v31, 8.507059e+37  ;;  %1192 = vpow2.f32 %v1107_v39 }
 0x83d   :  { %v1189_v54 = vpop.eup %1188 }
 0x83e   :  { %v674_v55 = vmul.f32 %v1189_v54, %v671_v51  ;;  %vm679_vm0 = vweird.f32 %v1189_v54  ;;  %v1191_v35 = vpop.eup %1190 }
 0x83f   :  { %vm680_vm15 = vmor %vm678_vm14, %vm679_vm0  ;;  %v1193_v40 = vpop.eup %1192 }
 0x840   :  { %v675_v28 = vsub.f32 1.0, %v674_v55  ;;  %v672_v42 = vadd.f32 1.0, %v1193_v40 }
 0x842   :  { %v676_v30 = vmul.f32 %v1189_v54, %v675_v28  ;;  %1194 = vrcp.f32 %v672_v42  ;;  %v699_v59 = vand.u32 2147483648, %v672_v42  ;;  %vm693_vm3 = vweird.f32 %v672_v42 }
 0x843   :  { %v697_v60 = vand.u32 2147483647, %v672_v42 }
 0x844   :  { %v677_v32 = vadd.f32 %v1189_v54, %v676_v30  ;;  %v700_v62 = vor.u32 1.1754944e-38, %v699_v59 }
 0x845   :  { %vm698_vm5 = vcmp.eq.f32.partialorder %v697_v60, 8.507059e+37 }
 0x846   :  { %v681_v34 = vsel %vm680_vm15, %v1189_v54, %v677_v32 }
 0x847   :  { %v686_v36 = vsel %vm683_vm1, %v685_v33, %v681_v34 }
 0x848   :  { %v705_v37 = vmul.f32 %v1191_v35, %v686_v36  ;;  %v1195_v43 = vpop.eup %1194  ;;  %v704_v49 = vmul.f32 %v686_v36, %v615_v11 }
 0x849   :  { %v689_v44 = vmul.f32 %v1195_v43, %v672_v42  ;;  %vm694_vm2 = vweird.f32 %v1195_v43 }
 0x84a   :  { %707 = vrot.lane.b32.xlu1 %v705_v37, %s1263_s1  ;;  %vm695_vm4 = vmor %vm693_vm3, %vm694_vm2 }
 0x84b   :  { %v690_v45 = vsub.f32 1.0, %v689_v44 }
 0x84d   :  { %v691_v56 = vmul.f32 %v1195_v43, %v690_v45 }
 0x84f   :  { %v692_v50 = vadd.f32 %v1195_v43, %v691_v56 }
 0x851   :  { %v696_v61 = vsel %vm695_vm4, %v1195_v43, %v692_v50 }
 0x852   :  { %v701_v1 = vsel %vm698_vm5, %v700_v62, %v696_v61 }
 0x8bc   :  { %v708_v57 = vpop.permute.xlu1 %707 }
 0x8bd   :  { %v710_v58 = vadd.f32 %v708_v57, %v704_v49 }
 0x8bf   :  { %1196 = vtanh.f32 %v710_v58 }
 0x8c5   :  { %v1197_v63 = vpop.eup %1196 }
 0x8c6   :  { %v712_v2 = vmul.f32 %v1197_v63, %v701_v1 }
 0x8c8   :  { %714 = vrot.lane.b32.xlu2 %v712_v2, %s1263_s1 }
 0x922   :  { %v715_v3 = vpop.permute.xlu2 %714 }
 0x923   :  { %1108 = vmatmul.msk.f32.vlgmr.msra.gmra.mxu2 %vm235_vm9, %v715_v3  ;;  %1109 = vmatmul.msk.f32.vlgmr.msra.gmra.mxu3 %vm235_vm9, %v715_v3 }
 0x9a6   :  { %v735_v4 = vpop.f32.mrf.mxu2  ;;  %v755_v11 = vpop.f32.mrf.mxu3 }
 0x9a7   :  { %v736_v5 = vadd.f32 %v735_v4, %v1591_v22  ;;  %v756_v12 = vadd.f32 %v755_v11, %v1595_v25 }
 0x9a9   :  { %v758_v6 = vadd.f32 %v736_v5, %v1472_v0  ;;  %v759_v14 = vadd.f32 %v756_v12, %v1475_v10 }
 0x9ab   :  { %v1110_v7 = vmul.f32 -1.442695, %v758_v6  ;;  %v1111_v25 = vmul.f32 -1.442695, %v759_v14 }
 0x9ad   :  { %1198 = vpow2.f32 %v1110_v7 }
 0x9b3   :  { %v1199_v8 = vpop.eup %1198 }
 0x9b4   :  { %v766_v9 = vadd.f32 1.0, %v1199_v8 }
 0x9b6   :  { %1200 = vrcp.f32 %v766_v9  ;;  %v779_v17 = vand.u32 2147483648, %v766_v9  ;;  %v777_v19 = vand.u32 2147483647, %v766_v9  ;;  %vm773_vm7 = vweird.f32 %v766_v9 }
 0x9b7   :  { %1202 = vtanh.f32 %v759_v14 }
 0x9b8   :  { %v780_v21 = vor.u32 1.1754944e-38, %v779_v17  ;;  %vm778_vm10 = vcmp.eq.f32.partialorder %v777_v19, 8.507059e+37  ;;  %1204 = vpow2.f32 %v1111_v25 }
 0x9bc   :  { %v1201_v13 = vpop.eup %1200 }
 0x9bd   :  { %v769_v15 = vmul.f32 %v1201_v13, %v766_v9  ;;  %vm774_vm6 = vweird.f32 %v1201_v13  ;;  %v1203_v23 = vpop.eup %1202 }
 0x9be   :  { %vm775_vm8 = vmor %vm773_vm7, %vm774_vm6  ;;  %v1205_v38 = vpop.eup %1204 }
 0x9bf   :  { %v770_v16 = vsub.f32 1.0, %v769_v15  ;;  %v767_v47 = vadd.f32 1.0, %v1205_v38 }
 0x9c1   :  { %v771_v18 = vmul.f32 %v1201_v13, %v770_v16  ;;  %1206 = vrcp.f32 %v767_v47  ;;  %v794_v29 = vand.u32 2147483648, %v767_v47  ;;  %vm788_vm12 = vweird.f32 %v767_v47 }
 0x9c2   :  { %v792_v30 = vand.u32 2147483647, %v767_v47 }
 0x9c3   :  { %v772_v20 = vadd.f32 %v1201_v13, %v771_v18  ;;  %v795_v32 = vor.u32 1.1754944e-38, %v794_v29 }
 0x9c4   :  { %vm793_vm0 = vcmp.eq.f32.partialorder %v792_v30, 8.507059e+37 }
 0x9c5   :  { %v776_v22 = vsel %vm775_vm8, %v1201_v13, %v772_v20 }
 0x9c6   :  { %v781_v26 = vsel %vm778_vm10, %v780_v21, %v776_v22 }
 0x9c7   :  { %v800_v27 = vmul.f32 %v1203_v23, %v781_v26  ;;  %v1207_v48 = vpop.eup %1206  ;;  %v799_v54 = vmul.f32 %v781_v26, %v710_v58 }
 0x9c8   :  { %v784_v51 = vmul.f32 %v1207_v48, %v767_v47  ;;  %vm789_vm11 = vweird.f32 %v1207_v48 }
 0x9c9   :  { %802 = vrot.lane.b32.xlu0 %v800_v27, %s1263_s1  ;;  %vm790_vm13 = vmor %vm788_vm12, %vm789_vm11 }
 0x9ca   :  { %v785_v52 = vsub.f32 1.0, %v784_v51 }
 0x9cc   :  { %v786_v53 = vmul.f32 %v1207_v48, %v785_v52 }
 0x9ce   :  { %v787_v28 = vadd.f32 %v1207_v48, %v786_v53 }
 0x9d0   :  { %v791_v31 = vsel %vm790_vm13, %v1207_v48, %v787_v28 }
 0x9d1   :  { %v796_v34 = vsel %vm793_vm0, %v795_v32, %v791_v31 }
 0xa3b   :  { %v803_v46 = vpop.permute.xlu0 %802 }
 0xa3c   :  { %v805_v55 = vadd.f32 %v803_v46, %v799_v54 }
 0xa3e   :  { %1208 = vtanh.f32 %v805_v55 }
 0xa44   :  { %v1209_v33 = vpop.eup %1208 }
 0xa45   :  { %v807_v35 = vmul.f32 %v1209_v33, %v796_v34 }
 0xa47   :  { %809 = vrot.lane.b32.xlu1 %v807_v35, %s1263_s1  ;;  %v1010_v35 = vld [vmem:[%s1693_s5 + $0x70] sm:$0xff] }
 0xa48   :  { %1031 = vmatpush.msrb.mxu0 %v1010_v35 }
 0xab9   :  { %v810_v36 = vpop.permute.xlu1 %809 }
 0xaba   :  { %1112 = vmatmul.msk.f32.vlgmr.msra.gmra.mxu0 %vm235_vm9, %v810_v36  ;;  %1113 = vmatmul.msk.f32.vlgmr.msra.gmra.mxu1 %vm235_vm9, %v810_v36  ;;  %v1011_v36 = vld [vmem:[%s1693_s5 + $0x78] sm:$0xff] }
 0xabb   :  { %1051 = vmatpush.msrb.mxu1 %v1011_v36 }
 0xb37   :  { %v830_v37 = vpop.f32.mrf.mxu0  ;;  %v850_v45 = vpop.f32.mrf.mxu1 }
 0xb38   :  { %v831_v39 = vadd.f32 %v830_v37, %v1593_v24  ;;  %v851_v56 = vadd.f32 %v850_v45, %v1598_v41  ;;  %v1008_v37 = vld [vmem:[%s1693_s5 + $0x60] sm:$0xff]  ;;  %v1002_v45 = vld [vmem:[%s1693_s5 + $0x30] sm:$0xff] }
 0xb39   :  { %1032 = vmatpush.msrb.mxu0 %v1008_v37 }
 0xb3a   :  { %v853_v40 = vadd.f32 %v831_v39, %v1472_v0  ;;  %v854_v57 = vadd.f32 %v851_v56, %v1475_v10  ;;  %v1009_v39 = vld [vmem:[%s1693_s5 + $0x68] sm:$0xff]  ;;  %v1003_v56 = vld [vmem:[%s1693_s5 + $0x38] sm:$0xff] }
 0xb3b   :  { %1052 = vmatpush.msrb.mxu1 %v1009_v39 }
 0xb3c   :  { %v1114_v42 = vmul.f32 -1.442695, %v853_v40  ;;  %v1115_v41 = vmul.f32 -1.442695, %v854_v57  ;;  %v1006_v40 = vld [vmem:[%s1693_s5 + $0x50] sm:$0xff] }
 0xb3d   :  { %1033 = vmatpush.msrb.mxu0 %v1006_v40 }
 0xb3e   :  { %1210 = vpow2.f32 %v1114_v42  ;;  %v1007_v42 = vld [vmem:[%s1693_s5 + $0x58] sm:$0xff] }
 0xb3f   :  { %1053 = vmatpush.msrb.mxu1 %v1007_v42 }
 0xb44   :  { %v1211_v43 = vpop.eup %1210 }
 0xb45   :  { %v861_v44 = vadd.f32 1.0, %v1211_v43  ;;  %v1004_v43 = vld [vmem:[%s1693_s5 + $0x40] sm:$0xff] }
 0xb46   :  { %1034 = vmatpush.msrb.mxu0 %v1004_v43 }
 0xb47   :  { %1212 = vrcp.f32 %v861_v44  ;;  %v874_v59 = vand.u32 2147483648, %v861_v44  ;;  %v872_v24 = vand.u32 2147483647, %v861_v44  ;;  %vm868_vm15 = vweird.f32 %v861_v44 }
 0xb48   :  { %1214 = vtanh.f32 %v854_v57  ;;  %v1000_v57 = vld [vmem:[%s1693_s5 + $0x20] sm:$0xff]  ;;  %1035 = vmatpush.msrb.mxu0 %v1002_v45 }
 0xb49   :  { %v875_v62 = vor.u32 1.1754944e-38, %v874_v59  ;;  %vm873_vm2 = vcmp.eq.f32.partialorder %v872_v24, 8.507059e+37  ;;  %1216 = vpow2.f32 %v1115_v41  ;;  %v998_v59 = vld [vmem:[%s1693_s5 + $0x10] sm:$0xff]  ;;  %v996_v24 = vld [vmem:[%s1693_s5] sm:$0xff] }
 0xb4a   :  { %1036 = vmatpush.msrb.mxu0 %v1000_v57 }
 0xb4c   :  { %1037 = vmatpush.msrb.mxu0 %v998_v59 }
 0xb4d   :  { %v1213_v49 = vpop.eup %1212 }
 0xb4e   :  { %v864_v58 = vmul.f32 %v1213_v49, %v861_v44  ;;  %vm869_vm14 = vweird.f32 %v1213_v49  ;;  %v1215_v1 = vpop.eup %1214  ;;  %v1005_v44 = vld [vmem:[%s1693_s5 + $0x48] sm:$0xff]  ;;  %1038 = vmatpush.msrb.mxu0 %v996_v24 }
 0xb4f   :  { %vm870_vm1 = vmor %vm868_vm15, %vm869_vm14  ;;  %v1217_v4 = vpop.eup %1216  ;;  %1054 = vmatpush.msrb.mxu1 %v1005_v44 }
 0xb50   :  { %v865_v50 = vsub.f32 1.0, %v864_v58  ;;  %v862_v5 = vadd.f32 1.0, %v1217_v4  ;;  %v1001_v58 = vld [vmem:[%s1693_s5 + $0x28] sm:$0xff] }
 0xb51   :  { %1055 = vmatpush.msrb.mxu1 %v1003_v56 }
 0xb52   :  { %v866_v60 = vmul.f32 %v1213_v49, %v865_v50  ;;  %1218 = vrcp.f32 %v862_v5  ;;  %v889_v15 = vand.u32 2147483648, %v862_v5  ;;  %vm883_vm4 = vweird.f32 %v862_v5 }
 0xb53   :  { %v887_v16 = vand.u32 2147483647, %v862_v5  ;;  %1056 = vmatpush.msrb.mxu1 %v1001_v58 }
 0xb54   :  { %v867_v61 = vadd.f32 %v1213_v49, %v866_v60  ;;  %v890_v18 = vor.u32 1.1754944e-38, %v889_v15  ;;  %v999_v60 = vld [vmem:[%s1693_s5 + $0x18] sm:$0xff] }
 0xb55   :  { %vm888_vm6 = vcmp.eq.f32.partialorder %v887_v16, 8.507059e+37  ;;  %1057 = vmatpush.msrb.mxu1 %v999_v60 }
 0xb56   :  { %v871_v63 = vsel %vm870_vm1, %v1213_v49, %v867_v61  ;;  %v997_v61 = vld [vmem:[%s1693_s5 + $0x8] sm:$0xff] }
 0xb57   :  { %v876_v2 = vsel %vm873_vm2, %v875_v62, %v871_v63  ;;  %1058 = vmatpush.msrb.mxu1 %v997_v61 }
 0xb58   :  { %v895_v3 = vmul.f32 %v1215_v1, %v876_v2  ;;  %v1219_v6 = vpop.eup %1218  ;;  %v894_v11 = vmul.f32 %v876_v2, %v805_v55 }
 0xb59   :  { %v879_v7 = vmul.f32 %v1219_v6, %v862_v5  ;;  %vm884_vm3 = vweird.f32 %v1219_v6 }
 0xb5a   :  { %897 = vrot.lane.b32.xlu2 %v895_v3, %s1263_s1  ;;  %vm885_vm5 = vmor %vm883_vm4, %vm884_vm3 }
 0xb5b   :  { %v880_v8 = vsub.f32 1.0, %v879_v7 }
 0xb5d   :  { %v881_v9 = vmul.f32 %v1219_v6, %v880_v8 }
 0xb5f   :  { %v882_v14 = vadd.f32 %v1219_v6, %v881_v9 }
 0xb61   :  { %v886_v17 = vsel %vm885_vm5, %v1219_v6, %v882_v14 }
 0xb62   :  { %v891_v20 = vsel %vm888_vm6, %v890_v18, %v886_v17 }
 0xbb4   :  { %v898_v12 = vpop.permute.xlu2 %897 }
 0xbb5   :  { %v1618_v13 = vadd.f32 %v898_v12, %v894_v11 }
 0xbb7   :  { %1220 = vtanh.f32 %v1618_v13 }
 0xbbd   :  { %v1221_v19 = vpop.eup %1220 }
 0xbbe   :  { %v902_v21 = vmul.f32 %v1221_v19, %v891_v20 }
 0xbc0   :  { %904 = vrot.lane.b32.xlu0 %v902_v21, %s1263_s1 }
 0xc32   :  { %v905_v22 = vpop.permute.xlu0 %904 }
 0xc33   :  { %1116 = vmatmul.msk.f32.vlgmr.msrb.gmra.mxu2 %vm235_vm9, %v905_v22  ;;  %1117 = vmatmul.msk.f32.vlgmr.msrb.gmra.mxu3 %vm235_vm9, %v905_v22 }
 0xcb6   :  { %v925_v23 = vpop.f32.mrf.mxu2  ;;  %v945_v47 = vpop.f32.mrf.mxu3 }
 0xcb7   :  { %v926_v26 = vadd.f32 %v925_v23, %v1472_v0  ;;  %v946_v51 = vadd.f32 %v945_v47, %v1475_v10 }
 0xcb9   :  { %v1118_v27 = vmul.f32 -1.442695, %v926_v26  ;;  %v1119_v33 = vmul.f32 -1.442695, %v946_v51 }
 0xcbb   :  { %1222 = vpow2.f32 %v1118_v27 }
 0xcc1   :  { %v1223_v25 = vpop.eup %1222 }
 0xcc2   :  { %v954_v38 = vadd.f32 1.0, %v1223_v25 }
 0xcc4   :  { %1224 = vrcp.f32 %v954_v38  ;;  %v967_v54 = vand.u32 2147483648, %v954_v38  ;;  %v965_v55 = vand.u32 2147483647, %v954_v38  ;;  %vm961_vm8 = vweird.f32 %v954_v38 }
 0xcc5   :  { %1226 = vtanh.f32 %v946_v51 }
 0xcc6   :  { %v968_v0 = vor.u32 1.1754944e-38, %v967_v54  ;;  %vm966_vm11 = vcmp.eq.f32.partialorder %v965_v55, 8.507059e+37  ;;  %1228 = vpow2.f32 %v1119_v33 }
 0xcca   :  { %v1225_v48 = vpop.eup %1224 }
 0xccb   :  { %v957_v52 = vmul.f32 %v1225_v48, %v954_v38  ;;  %vm962_vm7 = vweird.f32 %v1225_v48  ;;  %v1227_v30 = vpop.eup %1226 }
 0xccc   :  { %vm963_vm10 = vmor %vm961_vm8, %vm962_vm7  ;;  %v1229_v10 = vpop.eup %1228 }
 0xccd   :  { %v958_v53 = vsub.f32 1.0, %v957_v52  ;;  %v955_v34 = vadd.f32 1.0, %v1229_v10 }
 0xccf   :  { %v959_v46 = vmul.f32 %v1225_v48, %v958_v53  ;;  %1230 = vrcp.f32 %v955_v34  ;;  %v982_v4 = vand.u32 2147483648, %v955_v34  ;;  %vm976_vm13 = vweird.f32 %v955_v34 }
 0xcd0   :  { %v980_v5 = vand.u32 2147483647, %v955_v34 }
 0xcd1   :  { %v960_v28 = vadd.f32 %v1225_v48, %v959_v46  ;;  %v983_v7 = vor.u32 1.1754944e-38, %v982_v4 }
 0xcd2   :  { %vm981_vm14 = vcmp.eq.f32.partialorder %v980_v5, 8.507059e+37 }
 0xcd3   :  { %v964_v29 = vsel %vm963_vm10, %v1225_v48, %v960_v28 }
 0xcd4   :  { %v969_v31 = vsel %vm966_vm11, %v968_v0, %v964_v29 }
 0xcd5   :  { %v988_v32 = vmul.f32 %v1227_v30, %v969_v31  ;;  %v1231_v49 = vpop.eup %1230  ;;  %v987_v1 = vmul.f32 %v969_v31, %v1618_v13  ;;  %v1012_v13 = vld [vmem:[%s1694_s6] sm:$0x3] }
 0xcd6   :  { %v972_v50 = vmul.f32 %v1231_v49, %v955_v34  ;;  %vm977_vm12 = vweird.f32 %v1231_v49  ;;  %v1014_v14 = vperm.slane %v1012_v13, 0  ;;  %v1015_v15 = vperm.slane %v1012_v13, 1 }
 0xcd7   :  { %990 = vrot.lane.b32.xlu1 %v988_v32, %s1263_s1  ;;  %vm978_vm0 = vmor %vm976_vm13, %vm977_vm12 }
 0xcd8   :  { %v973_v62 = vsub.f32 1.0, %v972_v50 }
 0xcda   :  { %v974_v63 = vmul.f32 %v1231_v49, %v973_v62 }
 0xcdc   :  { %v975_v41 = vadd.f32 %v1231_v49, %v974_v63 }
 0xcde   :  { %v979_v6 = vsel %vm978_vm0, %v1231_v49, %v975_v41 }
 0xcdf   :  { %v984_v9 = vsel %vm981_vm14, %v983_v7, %v979_v6 }
 0xd49   :  { %v991_v2 = vpop.permute.xlu1 %990 }
 0xd4a   :  { %v993_v3 = vadd.f32 %v991_v2, %v987_v1 }
 0xd4c   :  { %1232 = vtanh.f32 %v993_v3 }
 0xd52   :  { %v1233_v8 = vpop.eup %1232 }
 0xd53   :  { %v995_v11 = vmul.f32 %v1233_v8, %v984_v9 }
 0xd55   :  { %1019 = vrot.lane.b32.xlu2 %v995_v11, %s1263_s1 }
 0xdaf   :  { %v1020_v12 = vpop.permute.xlu2 %1019 }
 0xdb0   :  { %1120 = vmatmul.msk.f32.vlgmr.msrb.gmra.mxu0 %vm235_vm9, %v1020_v12  ;;  %1121 = vmatmul.msk.f32.vlgmr.msrb.gmra.mxu1 %vm235_vm9, %v1020_v12 }
 0xe2d   :  { %v1040_v16 = vpop.f32.mrf.mxu0  ;;  %v1060_v17 = vpop.f32.mrf.mxu1 }
 0xe2e   :  { %v1041_v18 = vadd.f32 %v1040_v16, %v1014_v14  ;;  %v1061_v19 = vadd.f32 %v1060_v17, %v1015_v15 }
 0xe30   :  { %1063 = vst [vmem:[%s1695_s7] sm:$0xff] %v1041_v18 }
 0xe31   :  { %1064 = vst [vmem:[%s1695_s7 + $0x8] sm:$0xff] %v1061_v19 }
 0xe32   :  { %1069 = vsyncpa [#allocation3], 1 }

</bundles_post_ra>
